<compile_context>
chip_gen: v7x
topology: tpu7x:2x2x1
jax: 0.10.0
libtpu: 0.0.40
codegen_flags: <defaults>
</compile_context>

<pallas_src>
import functools

import jax
import jax.numpy as jnp
from jax import lax
from jax.experimental import pallas as pl
from jax.experimental.pallas import tpu as pltpu


# dot_general dimension numbers: contract dim 1 of both operands (A @ B.T
# without materializing a transpose -- the MXU consumes this natively).
_DN = (((1,), (1,)), ((), ()))
_NEG = -1e30


def _crf_kernel(emb_ref, mask_ref, w_src_ref, w_dst_ref, h_out_ref, loss_ref,
                *, alpha, beta, gamma, n_layer, n_real):
    emb = emb_ref[...]            # [Np, Hp]  zero-padded embedding_input (f32)
    # bf16 additive mask input (half the HBM/VMEM footprint); one convert pass
    # total, reused by every unrolled layer.
    mask_add = mask_ref[...].astype(jnp.float32)   # [Np, Np]
    w_src_row = w_src_ref[...]    # [1, Hp]   (W_fc.T @ w_src) as a row vector
    w_dst_row = w_dst_ref[...]    # [1, Hp]   (W_fc.T @ w_dst) as a row vector

    ca = alpha / (alpha + beta)
    cb = beta / (alpha + beta)

    h = emb
    p = None
    inv = None
    # n_layer is a small static int -> unrolled Python loop inside the kernel.
    for _ in range(n_layer):
        # Folded scores: s = (h @ W_fc.T) @ w_src == h @ (W_fc.T @ w_src), etc.
        d_col = lax.dot_general(h, w_dst_row, _DN,
                                preferred_element_type=jnp.float32)   # [Np, 1]
        s_row = lax.dot_general(w_src_row, h, _DN,
                                preferred_element_type=jnp.float32)   # [1, Np]
        # e[i, j] = leakyrelu(dst_score_i + src_score_j)
        e = d_col + s_row                                             # [Np, Np]
        e = jnp.maximum(e, gamma * e)        # LeakyReLU (0 < gamma < 1)
        e = e + mask_add
        # per-destination softmax over incoming edges only.  Off-edge entries
        # sit at ~-1e30, so exp(e - m) underflows to exactly 0: no 2nd select.
        m = jnp.max(e, axis=-1, keepdims=True)
        p = jnp.exp(e - m)                                            # unnorm.
        denom = jnp.sum(p, axis=-1, keepdims=True)
        inv = pl.reciprocal(denom)                                    # [Np, 1]
        # Deferred normalization: normalize the [Np, Hp] matmul output instead
        # of the [Np, Np] p matrix (exact up to f32 rounding order).
        crf_out = jnp.dot(p, h, preferred_element_type=jnp.float32) * inv
        h = ca * emb + cb * crf_out

    h_out_ref[...] = h

    # --- training loss ---
    # loss_a = sum_i ||h_i - emb_i||^2   (padded rows contribute exactly 0)
    diff = h - emb
    loss_a = jnp.sum(diff * diff)

    # loss_b = sum_i sum_j att[i, j] * ||h_i - h_j||_2  over edges j -> i,
    # with att from the LAST layer (matches the DGL reference, which reuses
    # the leftover edge scores).  Pairwise L2 via the gram identity; gram and
    # the row-form squared norms go through the MXU (no XLU transposes), and
    # the softmax normalization is again applied per-row AFTER the N^2 sum.
    # TODO(synk): gram-based distances lose precision for near-identical nodes
    #             vs. an explicit pairwise-difference norm (fine at f32 here).
    hh = h * h
    sq_col = jnp.sum(hh, axis=-1, keepdims=True)                      # [Np, 1]
    ones_row = jnp.ones((1, hh.shape[1]), jnp.float32)
    sq_row = lax.dot_general(ones_row, hh, _DN,
                             preferred_element_type=jnp.float32)      # [1, Np]
    gram = lax.dot_general(h, h, _DN,
                           preferred_element_type=jnp.float32)        # [Np, Np]
    dist = jnp.sqrt(jnp.maximum(sq_col + sq_row - 2.0 * gram, 0.0))
    loss_b = jnp.sum(jnp.sum(p * dist, axis=-1, keepdims=True) * inv)

    loss = (alpha * loss_a + beta * loss_b) / jnp.float32(n_real)
    loss_ref[0, 0] = loss


def _round_up(x, m):
    return ((x + m - 1) // m) * m


@functools.partial(jax.jit, static_argnames=("alpha", "beta", "gamma", "n_layer"))
def _crf_forward_impl(embedding_input, adj, w_fc, w_attn, *,
                      alpha, beta, gamma, n_layer):
    n, hdim = embedding_input.shape
    n_pad = _round_up(n, 128)     # lane-dense mask / attention columns
    h_pad = _round_up(hdim, 128)  # lane-dense embeddings / output store

    # Fold W_fc into the attention vectors (z only feeds the edge scores).
    w_src_eff = w_fc.T @ w_attn[0, :hdim]        # [H]
    w_dst_eff = w_fc.T @ w_attn[0, hdim:]        # [H]
    w_src_row = jnp.zeros((1, h_pad), jnp.float32).at[0, :hdim].set(w_src_eff)
    w_dst_row = jnp.zeros((1, h_pad), jnp.float32).at[0, :hdim].set(w_dst_eff)

    # Zero-pad nodes/hidden.  Padded rows get a self-loop in the MASK so their
    # softmax row stays finite; with zero embeddings they remain exactly 0 and
    # contribute exactly 0 to the loss (normalized by the real node count).
    emb_p = jnp.zeros((n_pad, h_pad), jnp.float32).at[:n, :hdim].set(
        embedding_input.astype(jnp.float32))

    # Additive edge mask built once in the wrapper; adj never enters the
    # kernel.  Shipped as bf16 (-1e30 is representable; the in-kernel add to
    # the f32 scores only needs it to be "very negative").
    # NOTE: real nodes with zero in-degree would get uniform attention over
    # all nodes here (the DGL reference would NaN); the test graph always has
    # self-loops, matching the reference semantics.
    neg = jnp.float32(_NEG)
    mask_small = jnp.where(adj > 0.0, 0.0, neg)                        # [n, n]
    mask_p = jnp.full((n_pad, n_pad), neg, jnp.float32).at[:n, :n].set(mask_small)
    idx = jnp.arange(n_pad)
    pad_self = (idx[:, None] == idx[None, :]) & (idx[:, None] >= n)
    mask_p = jnp.where(pad_self, 0.0, mask_p).astype(jnp.bfloat16)

    kernel = functools.partial(_crf_kernel,
                               alpha=float(alpha), beta=float(beta),
                               gamma=float(gamma), n_layer=int(n_layer),
                               n_real=int(n))
    h_out_p, loss = pl.pallas_call(
        kernel,
        out_shape=(jax.ShapeDtypeStruct((n_pad, h_pad), jnp.float32),
                   jax.ShapeDtypeStruct((1, 1), jnp.float32)),
        in_specs=[pl.BlockSpec(memory_space=pltpu.MemorySpace.VMEM)] * 4,
        out_specs=(pl.BlockSpec(memory_space=pltpu.MemorySpace.VMEM),
                   pl.BlockSpec(memory_space=pltpu.MemorySpace.SMEM)),
        compiler_params=pltpu.CompilerParams(
            vmem_limit_bytes=32 * 1024 * 1024),
    )(emb_p, mask_p, w_src_row, w_dst_row)
    return h_out_p[:n, :hdim], loss[0, 0]


def crf_forward(embedding_input, adj, w_fc, w_attn, *,
                alpha, beta, gamma=0.2, n_layer=2):
    """Pallas implementation of CRF.forward(embedding_input, graph, is_train=True)."""
    return _crf_forward_impl(embedding_input, adj, w_fc, w_attn,
                             alpha=float(alpha), beta=float(beta),
                             gamma=float(gamma), n_layer=int(n_layer))


def crf_reference(embedding_input, adj, w_fc, w_attn, *,
                  alpha, beta, gamma=0.2, n_layer=2):
    """Pure-JAX reference mirroring the PyTorch/DGL semantics (for sanity check)."""
    n, hid = embedding_input.shape
    w1 = w_attn[0, :hid]
    w2 = w_attn[0, hid:]
    emb = embedding_input
    mask = adj > 0.0
    h = emb
    att = None
    for _ in range(n_layer):
        z = h @ w_fc.T
        s = z @ w1
        d = z @ w2
        e = d[:, None] + s[None, :]
        e = jnp.where(e >= 0.0, e, gamma * e)
        e_m = jnp.where(mask, e, -1e30)
        p = jnp.where(mask, jnp.exp(e_m - jnp.max(e_m, -1, keepdims=True)), 0.0)
        att = p / jnp.sum(p, -1, keepdims=True)
        crf_out = att @ h
        h = (alpha * emb + beta * crf_out) / (alpha + beta)
    loss_a = jnp.sum((h - emb) ** 2, axis=-1)
    pdiff = h[:, None, :] - h[None, :, :]
    dist = jnp.sqrt(jnp.sum(pdiff * pdiff, axis=-1))
    loss_b = jnp.sum(att * dist, axis=-1)
    loss = jnp.mean(alpha * loss_a + beta * loss_b)
    return h, loss


if __name__ == "__main__":
    N, H = 16, 32          # args.hidden_size = 32, 16 graph nodes
    ALPHA, BETA, GAMMA = 1.0, 0.5, 0.2
    N_LAYER = 2

    key = jax.random.PRNGKey(0)
    k_emb, k_adj, k_wfc, k_attn = jax.random.split(key, 4)

    embedding_input = jax.random.normal(k_emb, (N, H), dtype=jnp.float32)

    # Random directed graph; self-loops ensure every node has >=1 incoming edge
    # (matches a DGL graph where every node participates in the reduce step).
    adj = jax.random.bernoulli(k_adj, 0.35, (N, N)).astype(jnp.float32)
    adj = jnp.maximum(adj, jnp.eye(N, dtype=jnp.float32))

    # Deterministic parameter init (Linear-style uniform bounds), no bias.
    bfc = 1.0 / jnp.sqrt(jnp.float32(H))
    w_fc = jax.random.uniform(k_wfc, (H, H), jnp.float32, -bfc, bfc)      # W_fc.weight [H, H]
    battn = 1.0 / jnp.sqrt(jnp.float32(2 * H))
    w_attn = jax.random.uniform(k_attn, (1, 2 * H), jnp.float32, -battn, battn)  # attn_fc.weight [1, 2H]

    h_out, loss = crf_forward(embedding_input, adj, w_fc, w_attn,
                              alpha=ALPHA, beta=BETA, gamma=GAMMA, n_layer=N_LAYER)
    jax.block_until_ready((h_out, loss))

    h_ref, loss_ref = crf_reference(embedding_input, adj, w_fc, w_attn,
                                    alpha=ALPHA, beta=BETA, gamma=GAMMA, n_layer=N_LAYER)
    assert jnp.allclose(h_out, h_ref, rtol=1e-4, atol=1e-4), "h_output mismatch"
    assert jnp.allclose(loss, loss_ref, rtol=1e-3, atol=1e-3), "loss mismatch"

    print("KERNEL_OK")
</pallas_src>

<mosaic_0001>
module attributes {stable_mosaic.version = 11 : i64} {
  func.func @_crf_kernel(%arg0: memref<128x128xf32, #tpu.memory_space<vmem>>, %arg1: memref<128x128xbf16, #tpu.memory_space<vmem>>, %arg2: memref<1x128xf32, #tpu.memory_space<vmem>>, %arg3: memref<1x128xf32, #tpu.memory_space<vmem>>, %arg4: memref<128x128xf32, #tpu.memory_space<vmem>>, %arg5: memref<1x1xf32, #tpu.memory_space<smem>>) attributes {dimension_semantics = [], scalar_prefetch = 0 : i64, scratch_operands = 0 : i64, tpu.core_type = #tpu.core_type<tc>} {
    %c0 = arith.constant 0 : index
    %c0_0 = arith.constant 0 : index
    %0 = vector.load %arg0[%c0, %c0_0] : memref<128x128xf32, #tpu.memory_space<vmem>>, vector<128x128xf32>
    %c0_1 = arith.constant 0 : index
    %c0_2 = arith.constant 0 : index
    %1 = vector.load %arg1[%c0_1, %c0_2] : memref<128x128xbf16, #tpu.memory_space<vmem>>, vector<128x128xbf16>
    %2 = arith.extf %1 : vector<128x128xbf16> to vector<128x128xf32>
    %c0_3 = arith.constant 0 : index
    %c0_4 = arith.constant 0 : index
    %3 = vector.load %arg2[%c0_3, %c0_4] : memref<1x128xf32, #tpu.memory_space<vmem>>, vector<1x128xf32>
    %c0_5 = arith.constant 0 : index
    %c0_6 = arith.constant 0 : index
    %4 = vector.load %arg3[%c0_5, %c0_6] : memref<1x128xf32, #tpu.memory_space<vmem>>, vector<1x128xf32>
    %cst = arith.constant dense<0.000000e+00> : vector<128x1xf32>
    %5 = tpu.matmul %0, %4, %cst {dimension_numbers = #tpu.dot_dimension_numbers<[1], [1], [0], [0], [0, 0, 1, 0], [], []>} : vector<128x128xf32>, vector<1x128xf32>, vector<128x1xf32> -> vector<128x1xf32>
    %cst_7 = arith.constant dense<0.000000e+00> : vector<1x128xf32>
    %6 = tpu.matmul %3, %0, %cst_7 {dimension_numbers = #tpu.dot_dimension_numbers<[1], [1], [0], [0], [0, 0, 1, 0], [], []>} : vector<1x128xf32>, vector<128x128xf32>, vector<1x128xf32> -> vector<1x128xf32>
    %7 = vector.broadcast %5 : vector<128x1xf32> to vector<128x128xf32>
    %8 = vector.broadcast %6 : vector<1x128xf32> to vector<128x128xf32>
    %9 = arith.addf %7, %8 : vector<128x128xf32>
    %cst_8 = arith.constant 2.000000e-01 : f32
    %10 = vector.broadcast %cst_8 : f32 to vector<128x128xf32>
    %11 = arith.mulf %10, %9 : vector<128x128xf32>
    %12 = arith.maximumf %9, %11 : vector<128x128xf32>
    %13 = arith.addf %12, %2 : vector<128x128xf32>
    %cst_9 = arith.constant dense<0xFF800000> : vector<128xf32>
    %14 = vector.multi_reduction <maximumf>, %13, %cst_9 [1] : vector<128x128xf32> to vector<128xf32>
    %15 = vector.shape_cast %14 : vector<128xf32> to vector<128x1xf32>
    %16 = vector.broadcast %15 : vector<128x1xf32> to vector<128x128xf32>
    %17 = arith.subf %13, %16 : vector<128x128xf32>
    %18 = math.exp %17 : vector<128x128xf32>
    %cst_10 = arith.constant dense<0.000000e+00> : vector<128xf32>
    %19 = vector.multi_reduction <add>, %18, %cst_10 [1] : vector<128x128xf32> to vector<128xf32>
    %20 = vector.shape_cast %19 : vector<128xf32> to vector<128x1xf32>
    %21 = tpu.reciprocal %20 : vector<128x1xf32> -> vector<128x1xf32>
    %cst_11 = arith.constant dense<0.000000e+00> : vector<128x128xf32>
    %22 = tpu.matmul %18, %0, %cst_11 {dimension_numbers = #tpu.dot_dimension_numbers<[1], [0], [0], [1], [0, 0, 1, 1], [], []>} : vector<128x128xf32>, vector<128x128xf32>, vector<128x128xf32> -> vector<128x128xf32>
    %23 = vector.broadcast %21 : vector<128x1xf32> to vector<128x128xf32>
    %24 = arith.mulf %22, %23 : vector<128x128xf32>
    %cst_12 = arith.constant 0.666666686 : f32
    %25 = vector.broadcast %cst_12 : f32 to vector<128x128xf32>
    %26 = arith.mulf %25, %0 : vector<128x128xf32>
    %cst_13 = arith.constant 0.333333343 : f32
    %27 = vector.broadcast %cst_13 : f32 to vector<128x128xf32>
    %28 = arith.mulf %27, %24 : vector<128x128xf32>
    %29 = arith.addf %26, %28 : vector<128x128xf32>
    %cst_14 = arith.constant dense<0.000000e+00> : vector<128x1xf32>
    %30 = tpu.matmul %29, %4, %cst_14 {dimension_numbers = #tpu.dot_dimension_numbers<[1], [1], [0], [0], [0, 0, 1, 0], [], []>} : vector<128x128xf32>, vector<1x128xf32>, vector<128x1xf32> -> vector<128x1xf32>
    %cst_15 = arith.constant dense<0.000000e+00> : vector<1x128xf32>
    %31 = tpu.matmul %3, %29, %cst_15 {dimension_numbers = #tpu.dot_dimension_numbers<[1], [1], [0], [0], [0, 0, 1, 0], [], []>} : vector<1x128xf32>, vector<128x128xf32>, vector<1x128xf32> -> vector<1x128xf32>
    %32 = vector.broadcast %30 : vector<128x1xf32> to vector<128x128xf32>
    %33 = vector.broadcast %31 : vector<1x128xf32> to vector<128x128xf32>
    %34 = arith.addf %32, %33 : vector<128x128xf32>
    %cst_16 = arith.constant 2.000000e-01 : f32
    %35 = vector.broadcast %cst_16 : f32 to vector<128x128xf32>
    %36 = arith.mulf %35, %34 : vector<128x128xf32>
    %37 = arith.maximumf %34, %36 : vector<128x128xf32>
    %38 = arith.addf %37, %2 : vector<128x128xf32>
    %cst_17 = arith.constant dense<0xFF800000> : vector<128xf32>
    %39 = vector.multi_reduction <maximumf>, %38, %cst_17 [1] : vector<128x128xf32> to vector<128xf32>
    %40 = vector.shape_cast %39 : vector<128xf32> to vector<128x1xf32>
    %41 = vector.broadcast %40 : vector<128x1xf32> to vector<128x128xf32>
    %42 = arith.subf %38, %41 : vector<128x128xf32>
    %43 = math.exp %42 : vector<128x128xf32>
    %cst_18 = arith.constant dense<0.000000e+00> : vector<128xf32>
    %44 = vector.multi_reduction <add>, %43, %cst_18 [1] : vector<128x128xf32> to vector<128xf32>
    %45 = vector.shape_cast %44 : vector<128xf32> to vector<128x1xf32>
    %46 = tpu.reciprocal %45 : vector<128x1xf32> -> vector<128x1xf32>
    %cst_19 = arith.constant dense<0.000000e+00> : vector<128x128xf32>
    %47 = tpu.matmul %43, %29, %cst_19 {dimension_numbers = #tpu.dot_dimension_numbers<[1], [0], [0], [1], [0, 0, 1, 1], [], []>} : vector<128x128xf32>, vector<128x128xf32>, vector<128x128xf32> -> vector<128x128xf32>
    %48 = vector.broadcast %46 : vector<128x1xf32> to vector<128x128xf32>
    %49 = arith.mulf %47, %48 : vector<128x128xf32>
    %cst_20 = arith.constant 0.666666686 : f32
    %50 = vector.broadcast %cst_20 : f32 to vector<128x128xf32>
    %51 = arith.mulf %50, %0 : vector<128x128xf32>
    %cst_21 = arith.constant 0.333333343 : f32
    %52 = vector.broadcast %cst_21 : f32 to vector<128x128xf32>
    %53 = arith.mulf %52, %49 : vector<128x128xf32>
    %54 = arith.addf %51, %53 : vector<128x128xf32>
    %c0_22 = arith.constant 0 : index
    %c0_23 = arith.constant 0 : index
    %55 = vector.load %arg4[%c0_22, %c0_23] : memref<128x128xf32, #tpu.memory_space<vmem>>, vector<128x128xf32>
    tpu.vector_store %arg4[%c0_22, %c0_23], %54 {strides = array<i32>} : memref<128x128xf32, #tpu.memory_space<vmem>>, vector<128x128xf32>,
    %56 = arith.subf %54, %0 : vector<128x128xf32>
    %57 = arith.mulf %56, %56 : vector<128x128xf32>
    %58 = vector.shape_cast %57 : vector<128x128xf32> to vector<1x128x128xf32>
    %cst_24 = arith.constant dense<0.000000e+00> : vector<1xf32>
    %59 = vector.multi_reduction <add>, %58, %cst_24 [1, 2] : vector<1x128x128xf32> to vector<1xf32>
    %60 = vector.shape_cast %59 : vector<1xf32> to vector<1x1x1xf32>
    %61 = vector.extract %60[0, 0, 0] : f32 from vector<1x1x1xf32>
    %62 = arith.mulf %54, %54 : vector<128x128xf32>
    %cst_25 = arith.constant dense<0.000000e+00> : vector<128xf32>
    %63 = vector.multi_reduction <add>, %62, %cst_25 [1] : vector<128x128xf32> to vector<128xf32>
    %64 = vector.shape_cast %63 : vector<128xf32> to vector<128x1xf32>
    %cst_26 = arith.constant 1.000000e+00 : f32
    %65 = vector.broadcast %cst_26 : f32 to vector<1x128xf32>
    %cst_27 = arith.constant dense<0.000000e+00> : vector<1x128xf32>
    %66 = tpu.matmul %65, %62, %cst_27 {dimension_numbers = #tpu.dot_dimension_numbers<[1], [1], [0], [0], [0, 0, 1, 0], [], []>} : vector<1x128xf32>, vector<128x128xf32>, vector<1x128xf32> -> vector<1x128xf32>
    %cst_28 = arith.constant dense<0.000000e+00> : vector<128x128xf32>
    %67 = tpu.matmul %54, %54, %cst_28 {dimension_numbers = #tpu.dot_dimension_numbers<[1], [1], [0], [0], [0, 0, 1, 0], [], []>} : vector<128x128xf32>, vector<128x128xf32>, vector<128x128xf32> -> vector<128x128xf32>
    %68 = vector.broadcast %64 : vector<128x1xf32> to vector<128x128xf32>
    %69 = vector.broadcast %66 : vector<1x128xf32> to vector<128x128xf32>
    %70 = arith.addf %68, %69 : vector<128x128xf32>
    %cst_29 = arith.constant 2.000000e+00 : f32
    %71 = vector.broadcast %cst_29 : f32 to vector<128x128xf32>
    %72 = arith.mulf %71, %67 : vector<128x128xf32>
    %73 = arith.subf %70, %72 : vector<128x128xf32>
    %cst_30 = arith.constant 0.000000e+00 : f32
    %74 = vector.broadcast %cst_30 : f32 to vector<128x128xf32>
    %75 = arith.maximumf %73, %74 : vector<128x128xf32>
    %76 = math.sqrt %75 : vector<128x128xf32>
    %77 = arith.mulf %43, %76 : vector<128x128xf32>
    %cst_31 = arith.constant dense<0.000000e+00> : vector<128xf32>
    %78 = vector.multi_reduction <add>, %77, %cst_31 [1] : vector<128x128xf32> to vector<128xf32>
    %79 = vector.shape_cast %78 : vector<128xf32> to vector<128x1xf32>
    %80 = arith.mulf %79, %46 : vector<128x1xf32>
    %81 = vector.shape_cast %80 : vector<128x1xf32> to vector<1x128x1xf32>
    %cst_32 = arith.constant dense<0.000000e+00> : vector<1xf32>
    %82 = vector.multi_reduction <add>, %81, %cst_32 [1, 2] : vector<1x128x1xf32> to vector<1xf32>
    %83 = vector.shape_cast %82 : vector<1xf32> to vector<1x1x1xf32>
    %84 = vector.extract %83[0, 0, 0] : f32 from vector<1x1x1xf32>
    %cst_33 = arith.constant 1.000000e+00 : f32
    %85 = arith.mulf %cst_33, %61 : f32
    %cst_34 = arith.constant 5.000000e-01 : f32
    %86 = arith.mulf %cst_34, %84 : f32
    %87 = arith.addf %85, %86 : f32
    %cst_35 = arith.constant 1.600000e+01 : f32
    %88 = arith.divf %87, %cst_35 : f32
    %c0_36 = arith.constant 0 : index
    %c0_37 = arith.constant 0 : index
    %89 = memref.load %arg5[%c0_36, %c0_37] : memref<1x1xf32, #tpu.memory_space<smem>>
    memref.store %88, %arg5[%c0_36, %c0_37] : memref<1x1xf32, #tpu.memory_space<smem>>
    return
  }
}

</mosaic_0001>

<bundles_post_ra>
// kernel: _crf_forward_impl.1
= control target key start
LH: loop header
LB: loop body
LE: loop exit
PB: predicated region body
PF: predicated region fallthrough
CT: control target
= control target key end

     0   :  { %v3797_v3 = vmov 0.0|0.0   ;;  %vm2576_vm0 = vmmov 0   ;;  %v2577_v6 = vmov 0.0   ;;  %s3779_s0 = inlined_call_operand.vmem [shape: f32[128,128], index: 0, kind: input, shape index: {}]   ;;  %s3780_s1 = inlined_call_operand.vmem [shape: bf16[128,128], index: 1, kind: input, shape index: {}]   ;;  %s3781_s2 = inlined_call_operand.vmem [shape: f32[1,128], index: 2, kind: input, shape index: {}]   ;;  %s3782_s3 = inlined_call_operand.vmem [shape: f32[1,128], index: 3, kind: input, shape index: {}]   ;;  %s3783_s4 = inlined_call_operand.vmem [shape: f32[128,128], index: 4, kind: output, shape index: {0}]   ;;  %s3784_s5 = inlined_call_operand.hbm [shape: f32[1,1], index: 5, kind: output, shape index: {1}]  }
   0x1   :  { %v2613_v0 = vld [vmem:[%s3779_s0] sm:$0xff]  ;;  %v2618_v1 = vld [vmem:[%s3779_s0 + $0x8] sm:$0xff]  ;;  %v2623_v2 = vld [vmem:[%s3779_s0 + $0x10] sm:$0xff]  ;;  %2210 = vmatprep.subr.bf16.mxu0 %v3797_v3  ;;  %1969 = vmatprep.mubr.msk.f32.mxu0 %vm2576_vm0, %v2577_v6 }
   0x2   :  { %v2211_v4 = vpack.c.bf16 %v2618_v1, %v2613_v0  ;;  %v2631_v5 = vld [vmem:[%s3779_s0 + $0x18] sm:$0xff]  ;;  %v2641_v8 = vld [vmem:[%s3779_s0 + $0x20] sm:$0xff]  ;;  %v2646_v9 = vld [vmem:[%s3779_s0 + $0x28] sm:$0xff] }
   0x3   :  { %v2214_v7 = vpack.c.bf16 %v2631_v5, %v2623_v2  ;;  %v2651_v10 = vld [vmem:[%s3782_s3] ss:$0 sm:$0xff] }
   0x4   :  { %2212 = vmatpush3.bf16.xpose.msra.mxu0 %v2211_v4  ;;  %2235 = vmatprep.subr.bf16.mxu1 %v2211_v4  ;;  %v78_v11 = vmul.f32 %v2651_v10, %v2623_v2  ;;  %v76_v12 = vmul.f32 %v2651_v10, %v2613_v0 }
   0x5   :  { %2213 = vmatprep.subr.bf16.mxu0 %v3797_v3  ;;  %2237 = vmatpush3.bf16.msra.mxu1 %v2211_v4 }
   0x6   :  { %2239 = vmatprep.subr.bf16.mxu1 %v2214_v7 }
   0x7   :  { %11 = vsyncpa [#allocation3], 0  ;;  %v2217_v13 = vpack.c.bf16 %v2646_v9, %v2641_v8  ;;  %96 = vadd.xlane.f32.xlu1 %v78_v11  ;;  %92 = vadd.xlane.f32.xlu0 %v76_v12  ;;  %v79_v14 = vmul.f32 %v2651_v10, %v2631_v5  ;;  %v2664_v15 = vld [vmem:[%s3779_s0 + $0x30] sm:$0xff]  ;;  %v2669_v16 = vld [vmem:[%s3779_s0 + $0x38] sm:$0xff]  ;;  %v77_v17 = vmul.f32 %v2651_v10, %v2618_v1  ;;  %v194_v48 = vlaneseq  ;;  %s2563_s28 = scalar_lea.hbm %s3784_s5, 16 }
   0x8   :  { %v2220_v18 = vpack.c.bf16 %v2669_v16, %v2664_v15  ;;  %v81_v19 = vmul.f32 %v2651_v10, %v2646_v9  ;;  %v2681_v20 = vld [vmem:[%s3779_s0 + $0x40] sm:$0xff]  ;;  %v2686_v21 = vld [vmem:[%s3779_s0 + $0x48] sm:$0xff]  ;;  %v80_v22 = vmul.f32 %v2651_v10, %v2641_v8  ;;  %v83_v24 = vmul.f32 %v2651_v10, %v2669_v16  ;;  %v2697_v25 = vld [vmem:[%s3779_s0 + $0x50] sm:$0xff]  ;;  %p2564_p0 = scmp.ne.s32.totalorder %s3784_s5, %s2563_s28  ;;  %p2567_p1 = scmp.lt.u32.totalorder %s2563_s28, %s3784_s5 }
   0x9   :  { %2241 = vmatpush3.bf16.msra.mxu1 %v2214_v7  ;;  %v2223_v23 = vpack.c.bf16 %v2686_v21, %v2681_v20  ;;  %v2702_v26 = vld [vmem:[%s3779_s0 + $0x58] sm:$0xff]  ;;  %v82_v27 = vmul.f32 %v2651_v10, %v2664_v15  ;;  %v85_v29 = vmul.f32 %v2651_v10, %v2686_v21  ;;  %v2714_v30 = vld [vmem:[%s3779_s0 + $0x60] sm:$0xff]  ;;  %v2719_v31 = vld [vmem:[%s3779_s0 + $0x68] sm:$0xff]  ;;  %v84_v32 = vmul.f32 %v2651_v10, %v2681_v20 }
   0xa   :  { %2243 = vmatprep.subr.bf16.mxu1 %v2217_v13  ;;  %v2226_v28 = vpack.c.bf16 %v2702_v26, %v2697_v25  ;;  %v2229_v33 = vpack.c.bf16 %v2719_v31, %v2714_v30  ;;  %v87_v34 = vmul.f32 %v2651_v10, %v2702_v26  ;;  %v2730_v35 = vld [vmem:[%s3779_s0 + $0x70] sm:$0xff]  ;;  %v2735_v36 = vld [vmem:[%s3779_s0 + $0x78] sm:$0xff]  ;;  %v86_v37 = vmul.f32 %v2651_v10, %v2697_v25  ;;  %v2757_v43 = vld [vmem:[%s3781_s2] sm:$0x1]  ;;  %p2569_p2 = pnand %p2567_p1, %p2564_p0 }
   0xb   :  { %98 = vadd.xlane.f32.xlu1 %v79_v14  ;;  %94 = vadd.xlane.f32.xlu0 %v77_v17  ;;  %v2232_v38 = vpack.c.bf16 %v2735_v36, %v2730_v35  ;;  %v89_v39 = vmul.f32 %v2651_v10, %v2719_v31  ;;  %v88_v40 = vmul.f32 %v2651_v10, %v2714_v30  ;;  %v195_v51 = vshrl.u32 %v194_v48, 7  ;;  %v2768_v58 = vld [vmem:[%s3780_s1] sm:$0xff]  }
   0xc   :  { %2215 = vmatpush3.bf16.xpose.msra.mxu0 %v2214_v7  ;;  %v91_v41 = vmul.f32 %v2651_v10, %v2735_v36  ;;  %v90_v42 = vmul.f32 %v2651_v10, %v2730_v35  ;;  %v1753_v7 = vunpack.c.l.bf16 %v2768_v58  ;;  %v1754_v12 = vunpack.c.h.bf16 %v2768_v58 }
   0xd   :  { %2216 = vmatprep.subr.bf16.mxu0 %v3797_v3  ;;  %2245 = vmatpush3.bf16.msra.mxu1 %v2217_v13  ;;  %v2760_v52 = vsub.s32 0, %v195_v51 }
   0xe   :  { %2247 = vmatprep.subr.bf16.mxu1 %v2220_v18 }
   0xf   :  { %102 = vadd.xlane.f32.xlu1 %v81_v19  ;;  %100 = vadd.xlane.f32.xlu0 %v80_v22 }
  0x11   :  { %2249 = vmatpush3.bf16.msra.mxu1 %v2220_v18 }
  0x12   :  { %2251 = vmatprep.subr.bf16.mxu1 %v2223_v23 }
  0x13   :  { %106 = vadd.xlane.f32.xlu1 %v83_v24  ;;  %104 = vadd.xlane.f32.xlu0 %v82_v27 }
  0x14   :  { %2218 = vmatpush3.bf16.xpose.msra.mxu0 %v2217_v13  ;;  %v2779_v13 = vld [vmem:[%s3780_s1 + $0x8] sm:$0xff]  }
  0x15   :  { %2219 = vmatprep.subr.bf16.mxu0 %v3797_v3  ;;  %2253 = vmatpush3.bf16.msra.mxu1 %v2223_v23  ;;  %v1757_v27 = vunpack.c.l.bf16 %v2779_v13 }
  0x16   :  { %2255 = vmatprep.subr.bf16.mxu1 %v2226_v28 }
  0x17   :  { %110 = vadd.xlane.f32.xlu1 %v85_v29  ;;  %108 = vadd.xlane.f32.xlu0 %v84_v32 }
  0x19   :  { %2257 = vmatpush3.bf16.msra.mxu1 %v2226_v28 }
  0x1a   :  { %2259 = vmatprep.subr.bf16.mxu1 %v2229_v33 }
  0x1b   :  { %114 = vadd.xlane.f32.xlu1 %v87_v34  ;;  %112 = vadd.xlane.f32.xlu0 %v86_v37 }
  0x1c   :  { %2221 = vmatpush3.bf16.xpose.msra.mxu0 %v2220_v18 }
  0x1d   :  { %2222 = vmatprep.subr.bf16.mxu0 %v3797_v3  ;;  %2261 = vmatpush3.bf16.msra.mxu1 %v2229_v33 }
  0x1e   :  { %2263 = vmatprep.subr.bf16.mxu1 %v2232_v38 }
  0x1f   :  { %118 = vadd.xlane.f32.xlu1 %v89_v39  ;;  %116 = vadd.xlane.f32.xlu0 %v88_v40 }
  0x21   :  { %2265 = vmatpush3.bf16.msra.mxu1 %v2232_v38 }
  0x22   :  { %2266 = vmatprep.subr.bf16.mxu1 %v3797_v3 }
  0x23   :  { %122 = vadd.xlane.f32.xlu1 %v91_v41  ;;  %120 = vadd.xlane.f32.xlu0 %v90_v42 }
  0x24   :  { %2224 = vmatpush3.bf16.xpose.msra.mxu0 %v2223_v23 }
  0x25   :  { %2225 = vmatprep.subr.bf16.mxu0 %v3797_v3 }
  0x2c   :  { %2227 = vmatpush3.bf16.xpose.msra.mxu0 %v2226_v28  ;;  %v1758_v28 = vunpack.c.h.bf16 %v2779_v13 }
  0x2d   :  { %2228 = vmatprep.subr.bf16.mxu0 %v3797_v3 }
  0x34   :  { %2230 = vmatpush3.bf16.xpose.msra.mxu0 %v2229_v33  ;;  %v2792_v33 = vld [vmem:[%s3780_s1 + $0x10] sm:$0xff]  }
  0x35   :  { %2231 = vmatprep.subr.bf16.mxu0 %v3797_v3 }
  0x3c   :  { %2233 = vmatpush3.bf16.xpose.msra.mxu0 %v2232_v38 }
  0x43   :  { %1970 = vmatmul.mubr.f32.vlgmr.msra.gmra.mrb[0].mxu0 %v2757_v43 }
  0x94   :  { %v93_v44 = vpop.xlane.xlu0 %92  ;;  %v97_v45 = vpop.xlane.xlu1 %96 }
  0x98   :  { %v95_v46 = vpop.xlane.xlu0 %94  ;;  %v99_v47 = vpop.xlane.xlu1 %98 }
  0x9c   :  { %v101_v49 = vpop.xlane.xlu0 %100  ;;  %v103_v50 = vpop.xlane.xlu1 %102 }
  0xa0   :  { %v105_v53 = vpop.xlane.xlu0 %104  ;;  %v107_v54 = vpop.xlane.xlu1 %106 }
  0xa4   :  { %v109_v61 = vpop.xlane.xlu0 %108  ;;  %v111_v4 = vpop.xlane.xlu1 %110 }
  0xa8   :  { %v113_v38 = vpop.xlane.xlu0 %112 }
 0x116   :  { %v190_v55 = vpop.f32.mrb[0].mxu0 }
 0x117   :  { %v2763_v56 = vrot.slane %v190_v55, %v2760_v52  ;;  %v1971_v57 = vpop.f32.mrb[1].mxu0 }
 0x119   :  { %v198_v59 = vadd.f32 %v2763_v56, %v93_v44  ;;  %v199_v60 = vadd.f32 %v2763_v56, %v95_v46  ;;  %v200_v62 = vadd.f32 %v2763_v56, %v97_v45  ;;  %v201_v63 = vadd.f32 %v2763_v56, %v99_v47  ;;  %v115_v44 = vpop.xlane.xlu1 %114 }
 0x11a   :  { %v202_v14 = vadd.f32 %v2763_v56, %v101_v49  ;;  %v203_v22 = vadd.f32 %v2763_v56, %v103_v50  ;;  %v204_v37 = vadd.f32 %v2763_v56, %v105_v53  ;;  %v205_v42 = vadd.f32 %v2763_v56, %v107_v54  ;;  %v2811_v49 = vld [vmem:[%s3780_s1 + $0x18] sm:$0xff]  }
 0x11b   :  { %v214_v11 = vmul.f32 0.2, %v198_v59  ;;  %v215_v17 = vmul.f32 0.2, %v199_v60  ;;  %v216_v18 = vmul.f32 0.2, %v200_v62  ;;  %v3796_v45 = vunpack.c.h.bf16 %v2792_v33 }
 0x11c   :  { %v217_v19 = vmul.f32 0.2, %v201_v63  ;;  %v218_v34 = vmul.f32 0.2, %v202_v14  ;;  %v219_v41 = vmul.f32 0.2, %v203_v22  ;;  %v3787_v46 = vunpack.c.l.bf16 %v2792_v33 }
 0x11d   :  { %v230_v23 = vmax.f32 %v198_v59, %v214_v11  ;;  %v231_v24 = vmax.f32 %v199_v60, %v215_v17  ;;  %v232_v32 = vmax.f32 %v200_v62, %v216_v18  ;;  %v220_v50 = vmul.f32 0.2, %v204_v37  ;;  %v117_v59 = vpop.xlane.xlu0 %116 }
 0x11e   :  { %v233_v40 = vmax.f32 %v201_v63, %v217_v19  ;;  %v234_v48 = vmax.f32 %v202_v14, %v218_v34  ;;  %v206_v51 = vadd.f32 %v2763_v56, %v109_v61  ;;  %v235_v54 = vmax.f32 %v203_v22, %v219_v41  ;;  %v119_v63 = vpop.xlane.xlu1 %118  ;;  %v2830_v14 = vld [vmem:[%s3780_s1 + $0x20] sm:$0xff]  }
 0x11f   :  { %v2787_v29 = vadd.f32 %v1753_v7, %v230_v23  ;;  %v2797_v39 = vadd.f32 %v1754_v12, %v231_v24  ;;  %v2806_v47 = vadd.f32 %v1757_v27, %v232_v32  ;;  %v221_v55 = vmul.f32 0.2, %v205_v42 }
 0x120   :  { %v2816_v53 = vadd.f32 %v1758_v28, %v233_v40  ;;  %v207_v57 = vadd.f32 %v2763_v56, %v111_v4  ;;  %v3786_v60 = vunpack.c.h.bf16 %v2811_v49  ;;  %v3785_v62 = vunpack.c.l.bf16 %v2811_v49 }
 0x121   :  { %262 = vmax.xlane.f32.xlu0 %v2787_v29  ;;  %264 = vmax.xlane.f32.xlu1 %v2797_v39  ;;  %v2825_v61 = vadd.f32 %v3787_v46, %v234_v48  ;;  %v236_v11 = vmax.f32 %v204_v37, %v220_v50  ;;  %v222_v4 = vmul.f32 0.2, %v206_v51  ;;  %v208_v17 = vadd.f32 %v2763_v56, %v113_v38  ;;  %v2849_v38 = vld [vmem:[%s3780_s1 + $0x28] sm:$0xff]  }
 0x122   :  { %v2835_v18 = vadd.f32 %v3796_v45, %v235_v54  ;;  %v237_v19 = vmax.f32 %v205_v42, %v221_v55  ;;  %v223_v22 = vmul.f32 0.2, %v207_v57  ;;  %v209_v23 = vadd.f32 %v2763_v56, %v115_v44  ;;  %v121_v42 = vpop.xlane.xlu0 %120  ;;  %v123_v55 = vpop.xlane.xlu1 %122 }
 0x123   :  { %v3795_v24 = vunpack.c.h.bf16 %v2830_v14  ;;  %v3794_v32 = vunpack.c.l.bf16 %v2830_v14  ;;  %v2844_v34 = vadd.f32 %v3785_v62, %v236_v11  ;;  %v238_v37 = vmax.f32 %v206_v51, %v222_v4 }
 0x124   :  { %v224_v40 = vmul.f32 0.2, %v208_v17  ;;  %v210_v41 = vadd.f32 %v2763_v56, %v117_v59  ;;  %v2854_v44 = vadd.f32 %v3786_v60, %v237_v19  ;;  %v239_v48 = vmax.f32 %v207_v57, %v223_v22  ;;  %v2874_v60 = vld [vmem:[%s3780_s1 + $0x30] sm:$0xff]  }
 0x125   :  { %266 = vmax.xlane.f32.xlu0 %v2806_v47  ;;  %268 = vmax.xlane.f32.xlu1 %v2816_v53  ;;  %v225_v50 = vmul.f32 0.2, %v209_v23  ;;  %v211_v54 = vadd.f32 %v2763_v56, %v119_v63  ;;  %v3793_v51 = vunpack.c.h.bf16 %v2849_v38  ;;  %v3788_v11 = vunpack.c.l.bf16 %v2849_v38 }
 0x126   :  { %v212_v59 = vadd.f32 %v2763_v56, %v121_v42  ;;  %v2864_v4 = vadd.f32 %v3794_v32, %v238_v37  ;;  %v240_v19 = vmax.f32 %v208_v17, %v224_v40  ;;  %v226_v57 = vmul.f32 0.2, %v210_v41 }
 0x127   :  { %v213_v22 = vadd.f32 %v2763_v56, %v123_v55  ;;  %v2869_v63 = vadd.f32 %v3795_v24, %v239_v48  ;;  %v241_v62 = vmax.f32 %v209_v23, %v225_v50  ;;  %v227_v46 = vmul.f32 0.2, %v211_v54  ;;  %v2891_v55 = vld [vmem:[%s3780_s1 + $0x38] sm:$0xff]  }
 0x128   :  { %v228_v37 = vmul.f32 0.2, %v212_v59  ;;  %v2880_v17 = vadd.f32 %v3788_v11, %v240_v19  ;;  %v3789_v56 = vunpack.c.l.bf16 %v2874_v60  ;;  %v242_v40 = vmax.f32 %v210_v41, %v226_v57 }
 0x129   :  { %270 = vmax.xlane.f32.xlu0 %v2825_v61  ;;  %272 = vmax.xlane.f32.xlu1 %v2835_v18  ;;  %v229_v42 = vmul.f32 0.2, %v213_v22  ;;  %v2885_v23 = vadd.f32 %v3793_v51, %v241_v62  ;;  %v3790_v48 = vunpack.c.h.bf16 %v2874_v60  ;;  %v243_v50 = vmax.f32 %v211_v54, %v227_v46 }
 0x12a   :  { %v2897_v41 = vadd.f32 %v3789_v56, %v242_v40  ;;  %v3791_v19 = vunpack.c.l.bf16 %v2891_v55  ;;  %v244_v62 = vmax.f32 %v212_v59, %v228_v37  ;;  %v3792_v46 = vunpack.c.h.bf16 %v2891_v55 }
 0x12b   :  { %v2902_v57 = vadd.f32 %v3790_v48, %v243_v50  ;;  %v245_v54 = vmax.f32 %v213_v22, %v229_v42 }
 0x12c   :  { %v2909_v11 = vadd.f32 %v3791_v19, %v244_v62 }
 0x12d   :  { %274 = vmax.xlane.f32.xlu0 %v2844_v34  ;;  %276 = vmax.xlane.f32.xlu1 %v2854_v44  ;;  %v2913_v40 = vadd.f32 %v3792_v46, %v245_v54 }
 0x131   :  { %278 = vmax.xlane.f32.xlu0 %v2864_v4  ;;  %280 = vmax.xlane.f32.xlu1 %v2869_v63 }
 0x135   :  { %282 = vmax.xlane.f32.xlu0 %v2880_v17  ;;  %284 = vmax.xlane.f32.xlu1 %v2885_v23 }
 0x139   :  { %286 = vmax.xlane.f32.xlu0 %v2897_v41  ;;  %288 = vmax.xlane.f32.xlu1 %v2902_v57 }
 0x13d   :  { %290 = vmax.xlane.f32.xlu0 %v2909_v11  ;;  %292 = vmax.xlane.f32.xlu1 %v2913_v40 }
 0x1ae   :  { %v263_v59 = vpop.xlane.xlu0 %262  ;;  %v265_v37 = vpop.xlane.xlu1 %264 }
 0x1af   :  { %v294_v22 = vsub.f32 %v2787_v29, %v263_v59  ;;  %v295_v42 = vsub.f32 %v2797_v39, %v265_v37 }
 0x1b1   :  { %v310_v50 = vmul.f32 1.442695, %v294_v22  ;;  %v312_v56 = vmul.f32 1.442695, %v295_v42 }
 0x1b2   :  { %v267_v48 = vpop.xlane.xlu0 %266  ;;  %v269_v62 = vpop.xlane.xlu1 %268 }
 0x1b3   :  { %2387 = vpow2.f32 %v310_v50  ;;  %v296_v19 = vsub.f32 %v2806_v47, %v267_v48  ;;  %v297_v54 = vsub.f32 %v2816_v53, %v269_v62 }
 0x1b4   :  { %2389 = vpow2.f32 %v312_v56 }
 0x1b5   :  { %v314_v46 = vmul.f32 1.442695, %v296_v19  ;;  %v316_v51 = vmul.f32 1.442695, %v297_v54 }
 0x1b6   :  { %v271_v32 = vpop.xlane.xlu0 %270  ;;  %v273_v24 = vpop.xlane.xlu1 %272 }
 0x1b7   :  { %2391 = vpow2.f32 %v314_v46  ;;  %v298_v45 = vsub.f32 %v2825_v61, %v271_v32  ;;  %v299_v29 = vsub.f32 %v2835_v18, %v273_v24 }
 0x1b8   :  { %2393 = vpow2.f32 %v316_v51 }
 0x1b9   :  { %v318_v39 = vmul.f32 1.442695, %v298_v45  ;;  %v320_v59 = vmul.f32 1.442695, %v299_v29 }
 0x1ba   :  { %v275_v37 = vpop.xlane.xlu0 %274  ;;  %v277_v22 = vpop.xlane.xlu1 %276 }
 0x1bb   :  { %2395 = vpow2.f32 %v318_v39  ;;  %v300_v47 = vsub.f32 %v2844_v34, %v275_v37  ;;  %v301_v53 = vsub.f32 %v2854_v44, %v277_v22 }
 0x1bc   :  { %2397 = vpow2.f32 %v320_v59 }
 0x1bd   :  { %v2388_v56 = vpop.eup %2387  ;;  %v322_v48 = vmul.f32 1.442695, %v300_v47  ;;  %v324_v46 = vmul.f32 1.442695, %v301_v53 }
 0x1be   :  { %v2390_v19 = vpop.eup %2389  ;;  %342 = vadd.xlane.f32.xlu0 %v2388_v56  ;;  %2004 = vmatprep.mubr.f32.mxu1 %v2388_v56  ;;  %v279_v61 = vpop.xlane.xlu0 %278 }
 0x1bf   :  { %2399 = vpow2.f32 %v322_v48  ;;  %344 = vadd.xlane.f32.xlu1 %v2390_v19  ;;  %v281_v18 = vpop.xlane.xlu1 %280  ;;  %v302_v45 = vsub.f32 %v2864_v4, %v279_v61  ;;  %2005 = vmatmul.mubr.f32.vlgmr.msra.gmra.mrb[0].mxu1 %v2390_v19 }
 0x1c0   :  { %2401 = vpow2.f32 %v324_v46  ;;  %v303_v24 = vsub.f32 %v2869_v63, %v281_v18 }
 0x1c1   :  { %v2392_v32 = vpop.eup %2391  ;;  %v326_v34 = vmul.f32 1.442695, %v302_v45 }
 0x1c2   :  { %v2394_v51 = vpop.eup %2393  ;;  %v328_v44 = vmul.f32 1.442695, %v303_v24  ;;  %346 = vadd.xlane.f32.xlu0 %v2392_v32  ;;  %2007 = vmatprep.mubr.f32.mxu1 %v2392_v32  ;;  %v283_v42 = vpop.xlane.xlu0 %282 }
 0x1c3   :  { %2403 = vpow2.f32 %v326_v34  ;;  %348 = vadd.xlane.f32.xlu1 %v2394_v51  ;;  %v285_v50 = vpop.xlane.xlu1 %284  ;;  %v304_v62 = vsub.f32 %v2880_v17, %v283_v42  ;;  %2008 = vmatmul.mubr.f32.gmra.mrb[2].mxu1 %v2394_v51 }
 0x1c4   :  { %2405 = vpow2.f32 %v328_v44  ;;  %v305_v4 = vsub.f32 %v2885_v23, %v285_v50 }
 0x1c5   :  { %v2396_v54 = vpop.eup %2395  ;;  %v330_v29 = vmul.f32 1.442695, %v304_v62 }
 0x1c6   :  { %v2398_v39 = vpop.eup %2397  ;;  %v332_v63 = vmul.f32 1.442695, %v305_v4  ;;  %350 = vadd.xlane.f32.xlu0 %v2396_v54  ;;  %2010 = vmatprep.mubr.f32.mxu1 %v2396_v54  ;;  %v287_v59 = vpop.xlane.xlu0 %286 }
 0x1c7   :  { %2407 = vpow2.f32 %v330_v29  ;;  %352 = vadd.xlane.f32.xlu1 %v2398_v39  ;;  %v289_v37 = vpop.xlane.xlu1 %288  ;;  %v306_v22 = vsub.f32 %v2897_v41, %v287_v59  ;;  %2011 = vmatmul.mubr.f32.gmra.mrb[4].mxu1 %v2398_v39 }
 0x1c8   :  { %2409 = vpow2.f32 %v332_v63  ;;  %v307_v17 = vsub.f32 %v2902_v57, %v289_v37 }
 0x1c9   :  { %v2400_v47 = vpop.eup %2399  ;;  %v334_v53 = vmul.f32 1.442695, %v306_v22 }
 0x1ca   :  { %v2402_v56 = vpop.eup %2401  ;;  %v336_v23 = vmul.f32 1.442695, %v307_v17  ;;  %354 = vadd.xlane.f32.xlu0 %v2400_v47  ;;  %2013 = vmatprep.mubr.f32.mxu1 %v2400_v47  ;;  %v291_v48 = vpop.xlane.xlu0 %290 }
 0x1cb   :  { %2411 = vpow2.f32 %v334_v53  ;;  %356 = vadd.xlane.f32.xlu1 %v2402_v56  ;;  %v293_v19 = vpop.xlane.xlu1 %292  ;;  %v308_v46 = vsub.f32 %v2909_v11, %v291_v48  ;;  %2014 = vmatmul.mubr.f32.gmra.mrb[6].mxu1 %v2402_v56  ;;  %v2936_v53 = vmul.f32 0.6666667, %v2618_v1  ;;  %v2939_v48 = vmul.f32 0.6666667, %v2613_v0 }
 0x1cc   :  { %2413 = vpow2.f32 %v336_v23  ;;  %v309_v41 = vsub.f32 %v2913_v40, %v293_v19  ;;  %v2943_v1 = vmul.f32 0.6666667, %v2631_v5 }
 0x1cd   :  { %v2404_v61 = vpop.eup %2403  ;;  %v338_v18 = vmul.f32 1.442695, %v308_v46 }
 0x1ce   :  { %v2406_v45 = vpop.eup %2405  ;;  %v340_v57 = vmul.f32 1.442695, %v309_v41  ;;  %358 = vadd.xlane.f32.xlu0 %v2404_v61  ;;  %2016 = vmatprep.mubr.f32.mxu1 %v2404_v61 }
 0x1cf   :  { %2415 = vpow2.f32 %v338_v18  ;;  %360 = vadd.xlane.f32.xlu1 %v2406_v45  ;;  %2017 = vmatmul.mubr.f32.gmra.mrb[8].mxu1 %v2406_v45 }
 0x1d0   :  { %2417 = vpow2.f32 %v340_v57 }
 0x1d1   :  { %v2408_v24 = vpop.eup %2407 }
 0x1d2   :  { %v2410_v32 = vpop.eup %2409  ;;  %362 = vadd.xlane.f32.xlu0 %v2408_v24  ;;  %2019 = vmatprep.mubr.f32.mxu1 %v2408_v24 }
 0x1d3   :  { %364 = vadd.xlane.f32.xlu1 %v2410_v32  ;;  %2020 = vmatmul.mubr.f32.gmra.mrb[10].mxu1 %v2410_v32 }
 0x1d5   :  { %v2412_v11 = vpop.eup %2411 }
 0x1d6   :  { %v2414_v34 = vpop.eup %2413  ;;  %366 = vadd.xlane.f32.xlu0 %v2412_v11  ;;  %2022 = vmatprep.mubr.f32.mxu1 %v2412_v11 }
 0x1d7   :  { %368 = vadd.xlane.f32.xlu1 %v2414_v34  ;;  %2023 = vmatmul.mubr.f32.gmra.mrb[12].mxu1 %v2414_v34 }
 0x1d9   :  { %v2416_v40 = vpop.eup %2415 }
 0x1da   :  { %v2418_v51 = vpop.eup %2417  ;;  %370 = vadd.xlane.f32.xlu0 %v2416_v40  ;;  %2025 = vmatprep.mubr.f32.mxu1 %v2416_v40  ;;  %v2947_v40 = vmul.f32 0.6666667, %v2623_v2 }
 0x1db   :  { %372 = vadd.xlane.f32.xlu1 %v2418_v51  ;;  %2026 = vmatmul.mubr.f32.gmra.mrb[14].mxu1 %v2418_v51 }
 0x1dc   :  { %2060 = vmatprep.mubr.msk.f32.mxu1 %vm2576_vm0, %v2577_v6 }
 0x24b   :  { %v343_v42 = vpop.xlane.xlu0 %342 }
 0x24c   :  { %v345_v44 = vpop.xlane.xlu1 %344 }
 0x24d   :  { %2419 = vrcp.f32 %v345_v44 }
 0x24e   :  { %2421 = vrcp.f32 %v343_v42 }
 0x24f   :  { %v347_v62 = vpop.xlane.xlu0 %346 }
 0x250   :  { %v349_v50 = vpop.xlane.xlu1 %348 }
 0x251   :  { %2423 = vrcp.f32 %v349_v50 }
 0x252   :  { %2425 = vrcp.f32 %v347_v62 }
 0x253   :  { %v351_v54 = vpop.xlane.xlu0 %350 }
 0x254   :  { %v353_v4 = vpop.xlane.xlu1 %352 }
 0x255   :  { %2427 = vrcp.f32 %v353_v4 }
 0x256   :  { %2429 = vrcp.f32 %v351_v54 }
 0x257   :  { %v355_v39 = vpop.xlane.xlu0 %354  ;;  %v2420_v37 = vpop.eup %2419 }
 0x258   :  { %v357_v29 = vpop.xlane.xlu1 %356  ;;  %v2422_v17 = vpop.eup %2421 }
 0x259   :  { %2431 = vrcp.f32 %v357_v29 }
 0x25a   :  { %2433 = vrcp.f32 %v355_v39 }
 0x25b   :  { %v359_v59 = vpop.xlane.xlu0 %358  ;;  %v2424_v41 = vpop.eup %2423 }
 0x25c   :  { %v361_v63 = vpop.xlane.xlu1 %360  ;;  %v2426_v57 = vpop.eup %2425 }
 0x25d   :  { %2435 = vrcp.f32 %v361_v63 }
 0x25e   :  { %2437 = vrcp.f32 %v359_v59 }
 0x25f   :  { %v363_v61 = vpop.xlane.xlu0 %362  ;;  %v2428_v42 = vpop.eup %2427 }
 0x260   :  { %v365_v19 = vpop.xlane.xlu1 %364  ;;  %v2430_v5 = vpop.eup %2429 }
 0x261   :  { %2439 = vrcp.f32 %v365_v19 }
 0x262   :  { %2441 = vrcp.f32 %v363_v61 }
 0x263   :  { %v367_v59 = vpop.xlane.xlu0 %366 }
 0x264   :  { %v369_v29 = vpop.xlane.xlu1 %368 }
 0x265   :  { %2443 = vrcp.f32 %v369_v29 }
 0x266   :  { %2445 = vrcp.f32 %v367_v59 }
 0x292   :  { %v2006_v22 = vpop.f32.mrb[0].mxu1 }
 0x293   :  { %v536_v47 = vmul.f32 %v2420_v37, %v2006_v22  ;;  %v456_v56 = vpop.f32.mrb[1].mxu1  ;;  %v2953_v37 = vmul.f32 0.6666667, %v2646_v9  ;;  %v2432_v9 = vpop.eup %2431 }
 0x294   :  { %v535_v23 = vmul.f32 %v2422_v17, %v456_v56 }
 0x295   :  { %v568_v46 = vmul.f32 0.33333334, %v536_v47  ;;  %v2957_v47 = vmul.f32 0.6666667, %v2641_v8 }
 0x296   :  { %v567_v18 = vmul.f32 0.33333334, %v535_v23  ;;  %v2009_v45 = vpop.f32.mrb[2].mxu1 }
 0x297   :  { %v584_v24 = vadd.f32 %v568_v46, %v2936_v53  ;;  %v538_v32 = vmul.f32 %v2424_v41, %v2009_v45  ;;  %v466_v11 = vpop.f32.mrb[3].mxu1  ;;  %v2434_v45 = vpop.eup %2433 }
 0x298   :  { %v583_v34 = vadd.f32 %v567_v18, %v2939_v48  ;;  %v537_v0 = vmul.f32 %v2426_v57, %v466_v11 }
 0x299   :  { %v570_v51 = vmul.f32 0.33333334, %v538_v32  ;;  %v600_v44 = vmul.f32 %v2651_v10, %v584_v24 }
 0x29a   :  { %v2267_v50 = vpack.c.bf16 %v584_v24, %v583_v34  ;;  %v569_v62 = vmul.f32 0.33333334, %v537_v0  ;;  %v2012_v4 = vpop.f32.mrb[4].mxu1  ;;  %v599_v54 = vmul.f32 %v2651_v10, %v583_v34  ;;  %v2964_v24 = vmul.f32 0.6666667, %v2669_v16  ;;  %v373_v0 = vpop.xlane.xlu1 %372 }
 0x29b   :  { %v586_v39 = vadd.f32 %v570_v51, %v2943_v1  ;;  %v540_v63 = vmul.f32 %v2428_v42, %v2012_v4  ;;  %617 = vadd.xlane.f32.xlu1 %v600_v44  ;;  %v476_v2 = vpop.f32.mrb[5].mxu1  ;;  %v2968_v34 = vmul.f32 0.6666667, %v2664_v15  ;;  %v2436_v42 = vpop.eup %2435  ;;  %2447 = vrcp.f32 %v373_v0 }
 0x29c   :  { %v585_v22 = vadd.f32 %v569_v62, %v2947_v40  ;;  %v539_v17 = vmul.f32 %v2430_v5, %v476_v2  ;;  %2268 = vmatpush3.bf16.xpose.msra.mxu1 %v2267_v50  ;;  %2291 = vmatprep.subr.bf16.mxu0 %v2267_v50  ;;  %v371_v16 = vpop.xlane.xlu0 %370  ;;  %v2438_v5 = vpop.eup %2437 }
 0x29d   :  { %v572_v56 = vmul.f32 0.33333334, %v540_v63  ;;  %615 = vadd.xlane.f32.xlu0 %v599_v54  ;;  %2293 = vmatpush3.bf16.msra.mxu0 %v2267_v50  ;;  %v602_v23 = vmul.f32 %v2651_v10, %v586_v39  ;;  %2449 = vrcp.f32 %v371_v16 }
 0x29e   :  { %v571_v46 = vmul.f32 0.33333334, %v539_v17  ;;  %v2015_v41 = vpop.f32.mrb[6].mxu1  ;;  %v2270_v18 = vpack.c.bf16 %v586_v39, %v585_v22  ;;  %v601_v19 = vmul.f32 %v2651_v10, %v585_v22  ;;  %2269 = vmatprep.subr.bf16.mxu1 %v3797_v3  ;;  %v2974_v39 = vmul.f32 0.6666667, %v2686_v21 }
 0x29f   :  { %v588_v8 = vadd.f32 %v572_v56, %v2953_v37  ;;  %v542_v57 = vmul.f32 %v2432_v9, %v2015_v41  ;;  %621 = vadd.xlane.f32.xlu1 %v602_v23  ;;  %v486_v61 = vpop.f32.mrb[7].mxu1  ;;  %v2978_v22 = vmul.f32 0.6666667, %v2681_v20  ;;  %v2440_v23 = vpop.eup %2439 }
 0x2a0   :  { %v587_v32 = vadd.f32 %v571_v46, %v2957_v47  ;;  %v541_v11 = vmul.f32 %v2434_v45, %v486_v61  ;;  %2295 = vmatprep.subr.bf16.mxu0 %v2270_v18  ;;  %v2987_v45 = vmul.f32 0.6666667, %v2702_v26 }
 0x2a1   :  { %v574_v51 = vmul.f32 0.33333334, %v542_v57  ;;  %619 = vadd.xlane.f32.xlu0 %v601_v19  ;;  %2297 = vmatpush3.bf16.msra.mxu0 %v2270_v18  ;;  %v604_v44 = vmul.f32 %v2651_v10, %v588_v8  ;;  %v2442_v19 = vpop.eup %2441 }
 0x2a2   :  { %v573_v50 = vmul.f32 0.33333334, %v541_v11  ;;  %v2018_v62 = vpop.f32.mrb[8].mxu1  ;;  %v2273_v4 = vpack.c.bf16 %v588_v8, %v587_v32  ;;  %v603_v54 = vmul.f32 %v2651_v10, %v587_v32  ;;  %v2991_v32 = vmul.f32 0.6666667, %v2697_v25 }
 0x2a3   :  { %v590_v29 = vadd.f32 %v574_v51, %v2964_v24  ;;  %v544_v15 = vmul.f32 %v2436_v42, %v2018_v62  ;;  %625 = vadd.xlane.f32.xlu1 %v604_v44  ;;  %v496_v63 = vpop.f32.mrb[9].mxu1  ;;  %v2444_v51 = vpop.eup %2443  ;;  %v2999_v25 = vmul.f32 0.6666667, %v2719_v31 }
 0x2a4   :  { %v589_v2 = vadd.f32 %v573_v50, %v2968_v34  ;;  %v543_v59 = vmul.f32 %v2438_v5, %v496_v63  ;;  %2271 = vmatpush3.bf16.xpose.msra.mxu1 %v2270_v18  ;;  %2299 = vmatprep.subr.bf16.mxu0 %v2273_v4  ;;  %v2446_v50 = vpop.eup %2445  ;;  %v3003_v63 = vmul.f32 0.6666667, %v2714_v30 }
 0x2a5   :  { %v576_v17 = vmul.f32 0.33333334, %v544_v15  ;;  %623 = vadd.xlane.f32.xlu0 %v603_v54  ;;  %2301 = vmatpush3.bf16.msra.mxu0 %v2273_v4  ;;  %v606_v56 = vmul.f32 %v2651_v10, %v590_v29 }
 0x2a6   :  { %v575_v21 = vmul.f32 0.33333334, %v543_v59  ;;  %v2021_v9 = vpop.f32.mrb[10].mxu1  ;;  %v2981_v46 = vpack.c.bf16 %v590_v29, %v589_v2  ;;  %v605_v41 = vmul.f32 %v2651_v10, %v589_v2  ;;  %2272 = vmatprep.subr.bf16.mxu1 %v3797_v3 }
 0x2a7   :  { %v592_v20 = vadd.f32 %v576_v17, %v2974_v39  ;;  %v546_v18 = vmul.f32 %v2440_v23, %v2021_v9  ;;  %629 = vadd.xlane.f32.xlu1 %v606_v56  ;;  %v506_v8 = vpop.f32.mrb[11].mxu1  ;;  %v2448_v17 = vpop.eup %2447 }
 0x2a8   :  { %v591_v57 = vadd.f32 %v575_v21, %v2978_v22  ;;  %v545_v61 = vmul.f32 %v2442_v19, %v506_v8  ;;  %2303 = vmatprep.subr.bf16.mxu0 %v2981_v46  ;;  %v2450_v9 = vpop.eup %2449  ;;  %v3014_v8 = vmul.f32 0.6666667, %v2730_v35 }
 0x2a9   :  { %v578_v11 = vmul.f32 0.33333334, %v546_v18  ;;  %627 = vadd.xlane.f32.xlu0 %v605_v41  ;;  %2305 = vmatpush3.bf16.msra.mxu0 %v2981_v46  ;;  %v608_v0 = vmul.f32 %v2651_v10, %v592_v20 }
 0x2aa   :  { %v577_v44 = vmul.f32 0.33333334, %v545_v61  ;;  %v2024_v26 = vpop.f32.mrb[12].mxu1  ;;  %v2279_v42 = vpack.c.bf16 %v592_v20, %v591_v57  ;;  %v607_v16 = vmul.f32 %v2651_v10, %v591_v57 }
 0x2ab   :  { %v594_v62 = vadd.f32 %v578_v11, %v2987_v45  ;;  %v548_v54 = vmul.f32 %v2444_v51, %v2024_v26  ;;  %633 = vadd.xlane.f32.xlu1 %v608_v0  ;;  %v516_v5 = vpop.f32.mrb[13].mxu1 }
 0x2ac   :  { %v593_v29 = vadd.f32 %v577_v44, %v2991_v32  ;;  %v547_v15 = vmul.f32 %v2446_v50, %v516_v5  ;;  %2274 = vmatpush3.bf16.xpose.msra.mxu1 %v2273_v4  ;;  %2307 = vmatprep.subr.bf16.mxu0 %v2279_v42  ;;  %v3010_v4 = vmul.f32 0.6666667, %v2735_v36 }
 0x2ad   :  { %v580_v2 = vmul.f32 0.33333334, %v548_v54  ;;  %631 = vadd.xlane.f32.xlu0 %v607_v16  ;;  %2309 = vmatpush3.bf16.msra.mxu0 %v2279_v42  ;;  %v610_v59 = vmul.f32 %v2651_v10, %v594_v62 }
 0x2ae   :  { %v579_v56 = vmul.f32 0.33333334, %v547_v15  ;;  %v2027_v23 = vpop.f32.mrb[14].mxu1  ;;  %v2282_v31 = vpack.c.bf16 %v594_v62, %v593_v29  ;;  %v609_v21 = vmul.f32 %v2651_v10, %v593_v29  ;;  %2275 = vmatprep.subr.bf16.mxu1 %v3797_v3 }
 0x2af   :  { %v596_v41 = vadd.f32 %v580_v2, %v2999_v25  ;;  %v550_v30 = vmul.f32 %v2448_v17, %v2027_v23  ;;  %637 = vadd.xlane.f32.xlu1 %v610_v59  ;;  %v526_v19 = vpop.f32.mrb[15].mxu1 }
 0x2b0   :  { %v595_v20 = vadd.f32 %v579_v56, %v3003_v63  ;;  %v549_v18 = vmul.f32 %v2450_v9, %v526_v19  ;;  %2311 = vmatprep.subr.bf16.mxu0 %v2282_v31 }
 0x2b1   :  { %v582_v57 = vmul.f32 0.33333334, %v550_v30  ;;  %635 = vadd.xlane.f32.xlu0 %v609_v21  ;;  %2313 = vmatpush3.bf16.msra.mxu0 %v2282_v31  ;;  %v612_v61 = vmul.f32 %v2651_v10, %v596_v41 }
 0x2b2   :  { %v581_v11 = vmul.f32 0.33333334, %v549_v18  ;;  %v2285_v0 = vpack.c.bf16 %v596_v41, %v595_v20  ;;  %v611_v51 = vmul.f32 %v2651_v10, %v595_v20 }
 0x2b3   :  { %v598_v36 = vadd.f32 %v582_v57, %v3010_v4  ;;  %641 = vadd.xlane.f32.xlu1 %v612_v61 }
 0x2b4   :  { %v597_v44 = vadd.f32 %v581_v11, %v3014_v8  ;;  %2277 = vmatpush3.bf16.xpose.msra.mxu1 %v2981_v46  ;;  %2315 = vmatprep.subr.bf16.mxu0 %v2285_v0 }
 0x2b5   :  { %639 = vadd.xlane.f32.xlu0 %v611_v51  ;;  %2317 = vmatpush3.bf16.msra.mxu0 %v2285_v0  ;;  %v614_v35 = vmul.f32 %v2651_v10, %v598_v36 }
 0x2b6   :  { %v2288_v26 = vpack.c.bf16 %v598_v36, %v597_v44  ;;  %v613_v16 = vmul.f32 %v2651_v10, %v597_v44  ;;  %2278 = vmatprep.subr.bf16.mxu1 %v3797_v3 }
 0x2b7   :  { %645 = vadd.xlane.f32.xlu1 %v614_v35 }
 0x2b8   :  { %2319 = vmatprep.subr.bf16.mxu0 %v2288_v26 }
 0x2b9   :  { %643 = vadd.xlane.f32.xlu0 %v613_v16  ;;  %2321 = vmatpush3.bf16.msra.mxu0 %v2288_v26 }
 0x2ba   :  { %2322 = vmatprep.subr.bf16.mxu0 %v3797_v3 }
 0x2bc   :  { %2280 = vmatpush3.bf16.xpose.msra.mxu1 %v2279_v42 }
 0x2bd   :  { %2281 = vmatprep.subr.bf16.mxu1 %v3797_v3 }
 0x2c4   :  { %2283 = vmatpush3.bf16.xpose.msra.mxu1 %v2282_v31 }
 0x2c5   :  { %2284 = vmatprep.subr.bf16.mxu1 %v3797_v3 }
 0x2cc   :  { %2286 = vmatpush3.bf16.xpose.msra.mxu1 %v2285_v0 }
 0x2cd   :  { %2287 = vmatprep.subr.bf16.mxu1 %v3797_v3 }
 0x2d4   :  { %2289 = vmatpush3.bf16.xpose.msra.mxu1 %v2288_v26 }
 0x2db   :  { %2061 = vmatmul.mubr.f32.vlgmr.msra.gmra.mrb[16].mxu1 %v2757_v43 }
 0x328   :  { %v618_v10 = vpop.xlane.xlu1 %617 }
 0x32a   :  { %v616_v46 = vpop.xlane.xlu0 %615 }
 0x32c   :  { %v622_v50 = vpop.xlane.xlu1 %621 }
 0x32e   :  { %v620_v62 = vpop.xlane.xlu0 %619 }
 0x330   :  { %v626_v54 = vpop.xlane.xlu1 %625 }
 0x332   :  { %v624_v5 = vpop.xlane.xlu0 %623 }
 0x334   :  { %v630_v29 = vpop.xlane.xlu1 %629 }
 0x336   :  { %v628_v15 = vpop.xlane.xlu0 %627 }
 0x338   :  { %v634_v9 = vpop.xlane.xlu1 %633 }
 0x33a   :  { %v632_v41 = vpop.xlane.xlu0 %631 }
 0x3ae   :  { %v713_v42 = vpop.f32.mrb[16].mxu1 }
 0x3af   :  { %v3030_v2 = vrot.slane %v713_v42, %v2760_v52  ;;  %v2062_v59 = vpop.f32.mrb[17].mxu1 }
 0x3b0   :  { %v3811_v59 = vunpack.c.l.bf16 %v2792_v33 }
 0x3b1   :  { %v722_v17 = vadd.f32 %v3030_v2, %v618_v10  ;;  %v721_v56 = vadd.f32 %v3030_v2, %v616_v46  ;;  %v724_v23 = vadd.f32 %v3030_v2, %v622_v50  ;;  %v723_v43 = vadd.f32 %v3030_v2, %v620_v62  ;;  %v638_v10 = vpop.xlane.xlu1 %637  ;;  %v636_v46 = vpop.xlane.xlu0 %635 }
 0x3b2   :  { %v726_v31 = vadd.f32 %v3030_v2, %v626_v54  ;;  %v725_v21 = vadd.f32 %v3030_v2, %v624_v5  ;;  %v728_v51 = vadd.f32 %v3030_v2, %v630_v29  ;;  %v727_v36 = vadd.f32 %v3030_v2, %v628_v15 }
 0x3b3   :  { %v738_v30 = vmul.f32 0.2, %v722_v17  ;;  %v737_v19 = vmul.f32 0.2, %v721_v56  ;;  %v740_v20 = vmul.f32 0.2, %v724_v23  ;;  %v729_v29 = vadd.f32 %v3030_v2, %v632_v41 }
 0x3b4   :  { %v739_v18 = vmul.f32 0.2, %v723_v43  ;;  %v742_v11 = vmul.f32 0.2, %v726_v31  ;;  %v741_v0 = vmul.f32 0.2, %v725_v21  ;;  %v3810_v15 = vunpack.c.h.bf16 %v2792_v33 }
 0x3b5   :  { %v754_v57 = vmax.f32 %v722_v17, %v738_v30  ;;  %v753_v61 = vmax.f32 %v721_v56, %v737_v19  ;;  %v756_v26 = vmax.f32 %v724_v23, %v740_v20  ;;  %v744_v54 = vmul.f32 0.2, %v728_v51  ;;  %v640_v56 = vpop.xlane.xlu0 %639 }
 0x3b6   :  { %v755_v16 = vmax.f32 %v723_v43, %v739_v18  ;;  %v758_v50 = vmax.f32 %v726_v31, %v742_v11  ;;  %v757_v62 = vmax.f32 %v725_v21, %v741_v0  ;;  %v743_v5 = vmul.f32 0.2, %v727_v36 }
 0x3b7   :  { %v3042_v44 = vadd.f32 %v1754_v12, %v754_v57  ;;  %v3046_v35 = vadd.f32 %v1753_v7, %v753_v61  ;;  %v3052_v12 = vadd.f32 %v1758_v28, %v756_v26  ;;  %v730_v7 = vadd.f32 %v3030_v2, %v634_v9 }
 0x3b8   :  { %v3056_v58 = vadd.f32 %v1757_v27, %v755_v16  ;;  %v3064_v42 = vadd.f32 %v3810_v15, %v758_v50  ;;  %v3068_v28 = vadd.f32 %v3811_v59, %v757_v62  ;;  %v760_v17 = vmax.f32 %v728_v51, %v744_v54  ;;  %v642_v27 = vpop.xlane.xlu1 %641 }
 0x3b9   :  { %787 = vmax.xlane.f32.xlu1 %v3042_v44  ;;  %785 = vmax.xlane.f32.xlu0 %v3046_v35  ;;  %v759_v13 = vmax.f32 %v727_v36, %v743_v5  ;;  %v746_v23 = vmul.f32 0.2, %v730_v7  ;;  %v745_v43 = vmul.f32 0.2, %v729_v29  ;;  %v732_v31 = vadd.f32 %v3030_v2, %v638_v10  ;;  %v644_v51 = vpop.xlane.xlu0 %643 }
 0x3ba   :  { %v731_v21 = vadd.f32 %v3030_v2, %v636_v46  ;;  %v3812_v9 = vunpack.c.h.bf16 %v2811_v49  ;;  %v3813_v33 = vunpack.c.l.bf16 %v2811_v49  ;;  %v734_v19 = vadd.f32 %v3030_v2, %v642_v27 }
 0x3bb   :  { %v733_v20 = vadd.f32 %v3030_v2, %v640_v56  ;;  %v762_v18 = vmax.f32 %v730_v7, %v746_v23  ;;  %v761_v57 = vmax.f32 %v729_v29, %v745_v43  ;;  %v748_v61 = vmul.f32 0.2, %v732_v31 }
 0x3bc   :  { %v3076_v41 = vadd.f32 %v3812_v9, %v760_v17  ;;  %v3080_v30 = vadd.f32 %v3813_v33, %v759_v13  ;;  %v747_v11 = vmul.f32 0.2, %v731_v21  ;;  %v646_v0 = vpop.xlane.xlu1 %645  ;;  %v750_v36 = vmul.f32 0.2, %v734_v19 }
 0x3bd   :  { %791 = vmax.xlane.f32.xlu1 %v3052_v12  ;;  %789 = vmax.xlane.f32.xlu0 %v3056_v58  ;;  %v749_v26 = vmul.f32 0.2, %v733_v20  ;;  %v736_v49 = vadd.f32 %v3030_v2, %v646_v0  ;;  %v735_v16 = vadd.f32 %v3030_v2, %v644_v51  ;;  %v3814_v10 = vunpack.c.h.bf16 %v2830_v14 }
 0x3be   :  { %v3815_v50 = vunpack.c.l.bf16 %v2830_v14  ;;  %v764_v54 = vmax.f32 %v732_v31, %v748_v61  ;;  %v763_v5 = vmax.f32 %v731_v21, %v747_v11  ;;  %v766_v7 = vmax.f32 %v734_v19, %v750_v36 }
 0x3bf   :  { %v3090_v46 = vadd.f32 %v3814_v10, %v762_v18  ;;  %v752_v29 = vmul.f32 0.2, %v736_v49  ;;  %v3816_v15 = vunpack.c.h.bf16 %v2849_v38  ;;  %v3817_v2 = vunpack.c.l.bf16 %v2849_v38 }
 0x3c0   :  { %v3094_v62 = vadd.f32 %v3815_v50, %v761_v57  ;;  %v765_v13 = vmax.f32 %v733_v20, %v749_v26  ;;  %v751_v14 = vmul.f32 0.2, %v735_v16  ;;  %v3818_v27 = vunpack.c.h.bf16 %v2874_v60 }
 0x3c1   :  { %795 = vmax.xlane.f32.xlu1 %v3064_v42  ;;  %793 = vmax.xlane.f32.xlu0 %v3068_v28  ;;  %v3100_v59 = vadd.f32 %v3816_v15, %v764_v54  ;;  %v3104_v17 = vadd.f32 %v3817_v2, %v763_v5  ;;  %v3819_v23 = vunpack.c.l.bf16 %v2874_v60  ;;  %v768_v31 = vmax.f32 %v736_v49, %v752_v29 }
 0x3c2   :  { %v3110_v56 = vadd.f32 %v3818_v27, %v766_v7  ;;  %v767_v21 = vmax.f32 %v735_v16, %v751_v14  ;;  %v3820_v38 = vunpack.c.h.bf16 %v2891_v55  ;;  %v3821_v33 = vunpack.c.l.bf16 %v2891_v55 }
 0x3c3   :  { %v3114_v43 = vadd.f32 %v3819_v23, %v765_v13 }
 0x3c4   :  { %v3120_v9 = vadd.f32 %v3820_v38, %v768_v31  ;;  %v3124_v19 = vadd.f32 %v3821_v33, %v767_v21 }
 0x3c5   :  { %799 = vmax.xlane.f32.xlu1 %v3076_v41  ;;  %797 = vmax.xlane.f32.xlu0 %v3080_v30 }
 0x3c9   :  { %803 = vmax.xlane.f32.xlu1 %v3090_v46  ;;  %801 = vmax.xlane.f32.xlu0 %v3094_v62 }
 0x3cd   :  { %807 = vmax.xlane.f32.xlu1 %v3100_v59  ;;  %805 = vmax.xlane.f32.xlu0 %v3104_v17 }
 0x3d1   :  { %811 = vmax.xlane.f32.xlu1 %v3110_v56  ;;  %809 = vmax.xlane.f32.xlu0 %v3114_v43 }
 0x3d5   :  { %815 = vmax.xlane.f32.xlu1 %v3120_v9  ;;  %813 = vmax.xlane.f32.xlu0 %v3124_v19 }
 0x446   :  { %v788_v60 = vpop.xlane.xlu1 %787  ;;  %v786_v20 = vpop.xlane.xlu0 %785 }
 0x447   :  { %v818_v18 = vsub.f32 %v3042_v44, %v788_v60  ;;  %v817_v57 = vsub.f32 %v3046_v35, %v786_v20 }
 0x449   :  { %v835_v61 = vmul.f32 1.442695, %v818_v18  ;;  %v833_v11 = vmul.f32 1.442695, %v817_v57 }
 0x44a   :  { %v792_v0 = vpop.xlane.xlu1 %791  ;;  %v790_v51 = vpop.xlane.xlu0 %789 }
 0x44b   :  { %2451 = vpow2.f32 %v835_v61  ;;  %v820_v36 = vsub.f32 %v3052_v12, %v792_v0  ;;  %v819_v55 = vsub.f32 %v3056_v58, %v790_v51 }
 0x44c   :  { %2453 = vpow2.f32 %v833_v11 }
 0x44d   :  { %v839_v26 = vmul.f32 1.442695, %v820_v36  ;;  %v837_v49 = vmul.f32 1.442695, %v819_v55 }
 0x44e   :  { %v796_v16 = vpop.xlane.xlu1 %795  ;;  %v794_v10 = vpop.xlane.xlu0 %793 }
 0x44f   :  { %2455 = vpow2.f32 %v839_v26  ;;  %v822_v50 = vsub.f32 %v3064_v42, %v796_v16  ;;  %v821_v44 = vsub.f32 %v3068_v28, %v794_v10 }
 0x450   :  { %2457 = vpow2.f32 %v837_v49 }
 0x451   :  { %v843_v35 = vmul.f32 1.442695, %v822_v50  ;;  %v841_v54 = vmul.f32 1.442695, %v821_v44 }
 0x452   :  { %v800_v5 = vpop.xlane.xlu1 %799  ;;  %v798_v7 = vpop.xlane.xlu0 %797 }
 0x453   :  { %2459 = vpow2.f32 %v843_v35  ;;  %v824_v12 = vsub.f32 %v3076_v41, %v800_v5  ;;  %v823_v58 = vsub.f32 %v3080_v30, %v798_v7 }
 0x454   :  { %2461 = vpow2.f32 %v841_v54 }
 0x455   :  { %v3136_v29 = vpop.eup %2451  ;;  %v847_v15 = vmul.f32 1.442695, %v824_v12  ;;  %v845_v2 = vmul.f32 1.442695, %v823_v58 }
 0x456   :  { %v3138_v13 = vpop.eup %2453  ;;  %867 = vadd.xlane.f32.xlu1 %v3136_v29  ;;  %v804_v42 = vpop.xlane.xlu1 %803 }
 0x457   :  { %v802_v28 = vpop.xlane.xlu0 %801  ;;  %2463 = vpow2.f32 %v847_v15  ;;  %v826_v14 = vsub.f32 %v3090_v46, %v804_v42  ;;  %865 = vadd.xlane.f32.xlu0 %v3138_v13  ;;  %2095 = vmatprep.mubr.f32.mxu0 %v3138_v13 }
 0x458   :  { %v825_v41 = vsub.f32 %v3094_v62, %v802_v28  ;;  %2465 = vpow2.f32 %v845_v2  ;;  %2096 = vmatmul.mubr.f32.vlgmr.msra.gmra.mrb[2].mxu0 %v3136_v29 }
 0x459   :  { %v3146_v30 = vpop.eup %2455  ;;  %v851_v27 = vmul.f32 1.442695, %v826_v14 }
 0x45a   :  { %v849_v23 = vmul.f32 1.442695, %v825_v41  ;;  %v3148_v31 = vpop.eup %2457  ;;  %871 = vadd.xlane.f32.xlu1 %v3146_v30  ;;  %v808_v21 = vpop.xlane.xlu1 %807 }
 0x45b   :  { %v806_v38 = vpop.xlane.xlu0 %805  ;;  %2467 = vpow2.f32 %v851_v27  ;;  %v828_v46 = vsub.f32 %v3100_v59, %v808_v21  ;;  %869 = vadd.xlane.f32.xlu0 %v3148_v31  ;;  %2098 = vmatprep.mubr.f32.mxu0 %v3148_v31 }
 0x45c   :  { %v827_v62 = vsub.f32 %v3104_v17, %v806_v38  ;;  %2469 = vpow2.f32 %v849_v23  ;;  %2099 = vmatmul.mubr.f32.gmra.mrb[4].mxu0 %v3146_v30 }
 0x45d   :  { %v3156_v33 = vpop.eup %2459  ;;  %v855_v60 = vmul.f32 1.442695, %v828_v46 }
 0x45e   :  { %v853_v20 = vmul.f32 1.442695, %v827_v62  ;;  %v3158_v18 = vpop.eup %2461  ;;  %875 = vadd.xlane.f32.xlu1 %v3156_v33  ;;  %v812_v57 = vpop.xlane.xlu1 %811 }
 0x45f   :  { %v810_v61 = vpop.xlane.xlu0 %809  ;;  %2471 = vpow2.f32 %v855_v60  ;;  %v830_v59 = vsub.f32 %v3110_v56, %v812_v57  ;;  %873 = vadd.xlane.f32.xlu0 %v3158_v18  ;;  %2101 = vmatprep.mubr.f32.mxu0 %v3158_v18 }
 0x460   :  { %v829_v17 = vsub.f32 %v3114_v43, %v810_v61  ;;  %2473 = vpow2.f32 %v853_v20  ;;  %2102 = vmatmul.mubr.f32.gmra.mrb[6].mxu0 %v3156_v33 }
 0x461   :  { %v3166_v11 = vpop.eup %2463  ;;  %v859_v0 = vmul.f32 1.442695, %v830_v59 }
 0x462   :  { %v857_v51 = vmul.f32 1.442695, %v829_v17  ;;  %v3168_v36 = vpop.eup %2465  ;;  %879 = vadd.xlane.f32.xlu1 %v3166_v11  ;;  %v816_v55 = vpop.xlane.xlu1 %815 }
 0x463   :  { %v814_v26 = vpop.xlane.xlu0 %813  ;;  %2475 = vpow2.f32 %v859_v0  ;;  %v832_v56 = vsub.f32 %v3120_v9, %v816_v55  ;;  %877 = vadd.xlane.f32.xlu0 %v3168_v36  ;;  %2104 = vmatprep.mubr.f32.mxu0 %v3168_v36 }
 0x464   :  { %v831_v43 = vsub.f32 %v3124_v19, %v814_v26  ;;  %2477 = vpow2.f32 %v857_v51  ;;  %2105 = vmatmul.mubr.f32.gmra.mrb[8].mxu0 %v3166_v11 }
 0x465   :  { %v3176_v49 = vpop.eup %2467  ;;  %v863_v16 = vmul.f32 1.442695, %v832_v56 }
 0x466   :  { %v861_v10 = vmul.f32 1.442695, %v831_v43  ;;  %v3178_v50 = vpop.eup %2469  ;;  %883 = vadd.xlane.f32.xlu1 %v3176_v49 }
 0x467   :  { %2479 = vpow2.f32 %v863_v16  ;;  %881 = vadd.xlane.f32.xlu0 %v3178_v50  ;;  %2107 = vmatprep.mubr.f32.mxu0 %v3178_v50 }
 0x468   :  { %2481 = vpow2.f32 %v861_v10  ;;  %2108 = vmatmul.mubr.f32.gmra.mrb[10].mxu0 %v3176_v49 }
 0x469   :  { %v3184_v9 = vpop.eup %2471 }
 0x46a   :  { %v3186_v19 = vpop.eup %2473  ;;  %887 = vadd.xlane.f32.xlu1 %v3184_v9 }
 0x46b   :  { %885 = vadd.xlane.f32.xlu0 %v3186_v19  ;;  %2110 = vmatprep.mubr.f32.mxu0 %v3186_v19 }
 0x46c   :  { %2111 = vmatmul.mubr.f32.gmra.mrb[12].mxu0 %v3184_v9 }
 0x46d   :  { %v3192_v44 = vpop.eup %2475 }
 0x46e   :  { %v3194_v35 = vpop.eup %2477  ;;  %891 = vadd.xlane.f32.xlu1 %v3192_v44 }
 0x46f   :  { %889 = vadd.xlane.f32.xlu0 %v3194_v35  ;;  %2113 = vmatprep.mubr.f32.mxu0 %v3194_v35 }
 0x470   :  { %2114 = vmatmul.mubr.f32.gmra.mrb[14].mxu0 %v3192_v44 }
 0x471   :  { %v3200_v54 = vpop.eup %2479 }
 0x472   :  { %v3202_v5 = vpop.eup %2481  ;;  %895 = vadd.xlane.f32.xlu1 %v3200_v54 }
 0x473   :  { %893 = vadd.xlane.f32.xlu0 %v3202_v5  ;;  %2116 = vmatprep.mubr.f32.mxu0 %v3202_v5 }
 0x474   :  { %2117 = vmatmul.mubr.f32.gmra.mrb[16].mxu0 %v3200_v54 }
 0x475   :  { %2151 = vmatprep.mubr.msk.f32.mxu0 %vm2576_vm0, %v2577_v6 }
 0x4e3   :  { %v868_v7 = vpop.xlane.xlu1 %867 }
 0x4e4   :  { %v866_v12 = vpop.xlane.xlu0 %865  ;;  %2483 = vrcp.f32 %v868_v7 }
 0x4e5   :  { %2485 = vrcp.f32 %v866_v12 }
 0x4e7   :  { %v872_v58 = vpop.xlane.xlu1 %871 }
 0x4e8   :  { %v870_v15 = vpop.xlane.xlu0 %869  ;;  %2487 = vrcp.f32 %v872_v58 }
 0x4e9   :  { %2489 = vrcp.f32 %v870_v15  ;;  %v2548_v15 = vld [vmem:[%s3779_s0] sm:$0xff] }
 0x4eb   :  { %v876_v2 = vpop.xlane.xlu1 %875 }
 0x4ec   :  { %v874_v42 = vpop.xlane.xlu0 %873  ;;  %2491 = vrcp.f32 %v876_v2 }
 0x4ed   :  { %2493 = vrcp.f32 %v874_v42 }
 0x4ee   :  { %v3210_v23 = vpop.eup %2483 }
 0x4ef   :  { %v880_v28 = vpop.xlane.xlu1 %879  ;;  %v3212_v38 = vpop.eup %2485 }
 0x4f0   :  { %v878_v14 = vpop.xlane.xlu0 %877  ;;  %2495 = vrcp.f32 %v880_v28 }
 0x4f1   :  { %2497 = vrcp.f32 %v878_v14 }
 0x4f2   :  { %v3216_v61 = vpop.eup %2487 }
 0x4f3   :  { %v884_v41 = vpop.xlane.xlu1 %883  ;;  %v3218_v0 = vpop.eup %2489 }
 0x4f4   :  { %v882_v27 = vpop.xlane.xlu0 %881  ;;  %2499 = vrcp.f32 %v884_v41 }
 0x4f5   :  { %2501 = vrcp.f32 %v882_v27 }
 0x4f6   :  { %v3236_v58 = vpop.eup %2491 }
 0x4f7   :  { %v888_v21 = vpop.xlane.xlu1 %887  ;;  %3822 = vst [vmem:[#allocation5_spill] sm:$0xff] %v3236_v58  ;;  %v3245_v27 = vpop.eup %2493 }
 0x4f8   :  { %v886_v60 = vpop.xlane.xlu0 %885  ;;  %2503 = vrcp.f32 %v888_v21 }
 0x4f9   :  { %2505 = vrcp.f32 %v886_v60 }
 0x4fb   :  { %v892_v56 = vpop.xlane.xlu1 %891 }
 0x4fc   :  { %2507 = vrcp.f32 %v892_v56 }
 0x52b   :  { %v2097_v6 = vpop.f32.mrb[2].mxu0 }
 0x52c   :  { %v1059_v46 = vmul.f32 %v3210_v23, %v2097_v6  ;;  %v979_v62 = vpop.f32.mrb[3].mxu0 }
 0x52d   :  { %v1058_v20 = vmul.f32 %v3212_v38, %v979_v62 }
 0x52e   :  { %v1075_v57 = vmul.f32 0.33333334, %v1059_v46 }
 0x52f   :  { %v1074_v59 = vmul.f32 0.33333334, %v1058_v20  ;;  %v2100_v17 = vpop.f32.mrb[4].mxu0 }
 0x530   :  { %v3221_v51 = vadd.f32 %v1075_v57, %v2936_v53  ;;  %v1061_v55 = vmul.f32 %v3216_v61, %v2100_v17  ;;  %v989_v26 = vpop.f32.mrb[5].mxu0  ;;  %v2547_v53 = vld [vmem:[%s3779_s0 + $0x8] sm:$0xff] }
 0x531   :  { %v1090_v43 = vadd.f32 %v1074_v59, %v2939_v48  ;;  %v1060_v16 = vmul.f32 %v3218_v0, %v989_v26  ;;  %v890_v48 = vpop.xlane.xlu0 %889  ;;  %v2549_v26 = vld [vmem:[%s3779_s0 + $0x18] sm:$0xff] }
 0x532   :  { %1107 = vst [vmem:[%s3783_s4 + $0x8] sm:$0xff] %v3221_v51  ;;  %v1123_v10 = vsub.f32 %v3221_v51, %v2547_v53  ;;  %v1077_v7 = vmul.f32 0.33333334, %v1061_v55  ;;  %v1179_v12 = vmul.f32 %v3221_v51, %v3221_v51  ;;  %v3263_v55 = vpop.eup %2495  ;;  %2509 = vrcp.f32 %v890_v48 }
 0x533   :  { %1106 = vst [vmem:[%s3783_s4] sm:$0xff] %v1090_v43  ;;  %v1122_v2 = vsub.f32 %v1090_v43, %v2548_v15  ;;  %v1076_v42 = vmul.f32 0.33333334, %v1060_v16  ;;  %v2103_v28 = vpop.f32.mrb[6].mxu0  ;;  %2186 = vmatprep.mubr.f32.mxu1 %v1090_v43  ;;  %v2346_v14 = vpack.c.bf16 %v3221_v51, %v1090_v43  ;;  %v1178_v41 = vmul.f32 %v1090_v43, %v1090_v43  ;;  %v2550_v43 = vld [vmem:[%s3779_s0 + $0x10] sm:$0xff] }
 0x534   :  { %v1139_v6 = vmul.f32 %v1123_v10, %v1123_v10  ;;  %v3248_v46 = vadd.f32 %v1077_v7, %v2943_v1  ;;  %v1063_v62 = vmul.f32 %v3236_v58, %v2103_v28  ;;  %1196 = vadd.xlane.f32.xlu1 %v1179_v12  ;;  %v999_v20 = vpop.f32.mrb[7].mxu0  ;;  %3823 = vst [vmem:[#allocation6_spill] sm:$0xff] %v3263_v55 }
 0x535   :  { %v1138_v57 = vmul.f32 %v1122_v2, %v1122_v2  ;;  %v3252_v59 = vadd.f32 %v1076_v42, %v2947_v40  ;;  %v1062_v17 = vmul.f32 %v3245_v27, %v999_v20  ;;  %2347 = vmatprep.subr.bf16.mxu1 %v2346_v14  ;;  %1194 = vadd.xlane.f32.xlu0 %v1178_v41  ;;  %v896_v40 = vpop.xlane.xlu1 %895 }
 0x536   :  { %1109 = vst [vmem:[%s3783_s4 + $0x18] sm:$0xff] %v3248_v46  ;;  %v1079_v1 = vmul.f32 0.33333334, %v1063_v62  ;;  %v2323_v21 = vpack.c.bf16 %v1179_v12, %v1178_v41  ;;  %2349 = vmatpush3.bf16.xpose.msra.mxu1 %v2346_v14  ;;  %v3261_v60 = vmul.f32 %v3248_v46, %v3248_v46  ;;  %v1125_v56 = vsub.f32 %v3248_v46, %v2549_v26  ;;  %v3279_v12 = vpop.eup %2497  ;;  %v894_v14 = vpop.xlane.xlu0 %893 }
 0x537   :  { %1108 = vst [vmem:[%s3783_s4 + $0x10] sm:$0xff] %v3252_v59  ;;  %v1124_v16 = vsub.f32 %v3252_v59, %v2550_v43  ;;  %v1078_v53 = vmul.f32 0.33333334, %v1062_v17  ;;  %v2106_v10 = vpop.f32.mrb[8].mxu0  ;;  %v2350_v7 = vpack.c.bf16 %v3248_v46, %v3252_v59  ;;  %3824 = vst [vmem:[#allocation7_spill] sm:$0xff] %v3279_v12  ;;  %v1154_v15 = vadd.f32 %v1139_v6, %v1138_v57  ;;  %v3305_v17 = vpop.eup %2499 }
 0x538   :  { %v3282_v2 = vadd.f32 %v1079_v1, %v2953_v37  ;;  %v1065_v42 = vmul.f32 %v3263_v55, %v2106_v10  ;;  %2324 = vmatpush3.bf16.xpose.msra.mxu0 %v2323_v21  ;;  %1200 = vadd.xlane.f32.xlu1 %v3261_v60  ;;  %v1009_v28 = vpop.f32.mrb[9].mxu0  ;;  %v1180_v48 = vmul.f32 %v3252_v59, %v3252_v59  ;;  %2511 = vrcp.f32 %v896_v40  ;;  %v2551_v37 = vld [vmem:[%s3779_s0 + $0x28] sm:$0xff]  ;;  %v2552_v40 = vld [vmem:[%s3779_s0 + $0x20] sm:$0xff] }
 0x539   :  { %v1140_v41 = vmul.f32 %v1124_v16, %v1124_v16  ;;  %v3287_v62 = vadd.f32 %v1078_v53, %v2957_v47  ;;  %v1064_v20 = vmul.f32 %v3279_v12, %v1009_v28  ;;  %2351 = vmatprep.subr.bf16.mxu1 %v2350_v7  ;;  %2325 = vmatprep.subr.bf16.mxu0 %v3797_v3  ;;  %v3315_v53 = vpop.eup %2501  ;;  %2513 = vrcp.f32 %v894_v14 }
 0x53a   :  { %1111 = vst [vmem:[%s3783_s4 + $0x28] sm:$0xff] %v3282_v2  ;;  %v1127_v6 = vsub.f32 %v3282_v2, %v2551_v37  ;;  %v1081_v47 = vmul.f32 0.33333334, %v1065_v42  ;;  %v3302_v57 = vmul.f32 %v3282_v2, %v3282_v2  ;;  %3825 = vst [vmem:[#allocation8_spill] sm:$0xff] %v3305_v17  ;;  %v1141_v1 = vmul.f32 %v1125_v56, %v1125_v56  ;;  %v3330_v14 = vpop.eup %2503 }
 0x53b   :  { %v1155_v21 = vadd.f32 %v1154_v15, %v1140_v41  ;;  %1110 = vst [vmem:[%s3783_s4 + $0x20] sm:$0xff] %v3287_v62  ;;  %v1126_v26 = vsub.f32 %v3287_v62, %v2552_v40  ;;  %v1080_v43 = vmul.f32 0.33333334, %v1064_v20  ;;  %1198 = vadd.xlane.f32.xlu0 %v1180_v48  ;;  %v2109_v16 = vpop.f32.mrb[10].mxu0  ;;  %3826 = vst [vmem:[#allocation9_spill] sm:$0xff] %v3315_v53 }
 0x53c   :  { %v3318_v56 = vadd.f32 %v1081_v47, %v2964_v24  ;;  %v1067_v10 = vmul.f32 %v3305_v17, %v2109_v16  ;;  %1204 = vadd.xlane.f32.xlu1 %v3302_v57  ;;  %v1019_v15 = vpop.f32.mrb[11].mxu0  ;;  %v3324_v42 = vmul.f32 %v3287_v62, %v3287_v62  ;;  %3827 = vst [vmem:[#allocation10_spill] sm:$0xff] %v3330_v14 }
 0x53d   :  { %v1142_v28 = vmul.f32 %v1126_v26, %v1126_v26  ;;  %v1156_v41 = vadd.f32 %v1155_v21, %v1141_v1  ;;  %v3327_v20 = vadd.f32 %v1080_v43, %v2968_v34  ;;  %v1066_v37 = vmul.f32 %v3315_v53, %v1019_v15  ;;  %v3339_v21 = vpop.eup %2505 }
 0x53e   :  { %v1143_v24 = vmul.f32 %v1127_v6, %v1127_v6  ;;  %1113 = vst [vmem:[%s3783_s4 + $0x38] sm:$0xff] %v3318_v56  ;;  %v2326_v47 = vpack.c.bf16 %v3261_v60, %v1180_v48  ;;  %v1083_v40 = vmul.f32 0.33333334, %v1067_v10  ;;  %2353 = vmatpush3.bf16.xpose.msra.mxu1 %v2350_v7  ;;  %v2354_v1 = vpack.c.bf16 %v3282_v2, %v3287_v62  ;;  %v2553_v6 = vld [vmem:[%s3779_s0 + $0x30] sm:$0xff]  ;;  %v3354_v43 = vpop.eup %2507 }
 0x53f   :  { %3828 = vst [vmem:[#allocation11_spill] sm:$0xff] %v3339_v21  ;;  %v1157_v34 = vadd.f32 %v1156_v41, %v1142_v28  ;;  %1112 = vst [vmem:[%s3783_s4 + $0x30] sm:$0xff] %v3327_v20  ;;  %v1128_v26 = vsub.f32 %v3327_v20, %v2553_v6  ;;  %v1082_v60 = vmul.f32 0.33333334, %v1066_v37  ;;  %1202 = vadd.xlane.f32.xlu0 %v3324_v42  ;;  %v2112_v7 = vpop.f32.mrb[12].mxu0  ;;  %v3365_v3 = vpop.eup %2509 }
 0x540   :  { %v3352_v48 = vmul.f32 %v3318_v56, %v3318_v56  ;;  %3829 = vst [vmem:[#allocation12_spill] sm:$0xff] %v3354_v43  ;;  %v3357_v16 = vadd.f32 %v1083_v40, %v2974_v39  ;;  %v1069_v10 = vmul.f32 %v3330_v14, %v2112_v7  ;;  %2327 = vmatpush3.bf16.xpose.msra.mxu0 %v2326_v47  ;;  %v1029_v15 = vpop.f32.mrb[13].mxu0  ;;  %3830 = vst [vmem:[#allocation13_spill] sm:$0xff] %v3365_v3 }
 0x541   :  { %2355 = vmatprep.subr.bf16.mxu1 %v2354_v1  ;;  %v1144_v28 = vmul.f32 %v1128_v26, %v1128_v26  ;;  %v1158_v41 = vadd.f32 %v1157_v34, %v1143_v24  ;;  %v3361_v37 = vadd.f32 %v1082_v60, %v2978_v22  ;;  %v1068_v6 = vmul.f32 %v3339_v21, %v1029_v15 }
 0x542   :  { %1208 = vadd.xlane.f32.xlu1 %v3352_v48  ;;  %1115 = vst [vmem:[%s3783_s4 + $0x48] sm:$0xff] %v3357_v16  ;;  %v1085_v39 = vmul.f32 0.33333334, %v1069_v10  ;;  %v3373_v47 = vmul.f32 %v3327_v20, %v3327_v20  ;;  %v3377_v22 = vmul.f32 %v3357_v16, %v3357_v16  ;;  %v3831_v24 = vmov 0.0|0.0   ;;  %v3384_v60 = vpop.eup %2511 }
 0x543   :  { %2328 = vmatprep.subr.bf16.mxu0 %v3831_v24  ;;  %v1159_v40 = vadd.f32 %v1158_v41, %v1144_v28  ;;  %1114 = vst [vmem:[%s3783_s4 + $0x40] sm:$0xff] %v3361_v37  ;;  %v1084_v34 = vmul.f32 0.33333334, %v1068_v6  ;;  %v2115_v26 = vpop.f32.mrb[14].mxu0  ;;  %3832 = vst [vmem:[#allocation14_spill] sm:$0xff] %v3384_v60  ;;  %v3393_v28 = vmul.f32 %v3361_v37, %v3361_v37  ;;  %v2554_v41 = vld [vmem:[%s3779_s0 + $0x38] sm:$0xff] }
 0x544   :  { %v3387_v7 = vadd.f32 %v1085_v39, %v2987_v45  ;;  %1206 = vadd.xlane.f32.xlu0 %v3373_v47  ;;  %v1071_v10 = vmul.f32 %v3354_v43, %v2115_v26  ;;  %v1039_v15 = vpop.f32.mrb[15].mxu0  ;;  %v1129_v6 = vsub.f32 %v3318_v56, %v2554_v41  ;;  %v3404_v39 = vpop.eup %2513  ;;  %v2555_v26 = vld [vmem:[%s3779_s0 + $0x40] sm:$0xff]  ;;  %v2329_v21 = vpack.c.bf16 %v3302_v57, %v3324_v42 }
 0x545   :  { %v3400_v14 = vadd.f32 %v1084_v34, %v2991_v32  ;;  %v1070_v45 = vmul.f32 %v3365_v3, %v1039_v15  ;;  %3833 = vst [vmem:[#allocation15_spill] sm:$0xff] %v3404_v39  ;;  %v1130_v43 = vsub.f32 %v3361_v37, %v2555_v26  ;;  %v2556_v15 = vld [vmem:[%s3779_s0 + $0x48] sm:$0xff]  ;;  %v2335_v53 = vpack.c.bf16 %v3377_v22, %v3393_v28 }
 0x546   :  { %1212 = vadd.xlane.f32.xlu1 %v3377_v22  ;;  %1117 = vst [vmem:[%s3783_s4 + $0x58] sm:$0xff] %v3387_v7  ;;  %v1087_v32 = vmul.f32 0.33333334, %v1071_v10  ;;  %2357 = vmatpush3.bf16.xpose.msra.mxu1 %v2354_v1  ;;  %v3418_v34 = vmul.f32 %v3387_v7, %v3387_v7  ;;  %v1131_v41 = vsub.f32 %v3357_v16, %v2556_v15 }
 0x547   :  { %1116 = vst [vmem:[%s3783_s4 + $0x50] sm:$0xff] %v3400_v14  ;;  %v1086_v57 = vmul.f32 0.33333334, %v1070_v45  ;;  %v2118_v42 = vpop.f32.mrb[16].mxu0  ;;  %v2358_v1 = vpack.c.bf16 %v3318_v56, %v3327_v20  ;;  %v3437_v15 = vmul.f32 %v3400_v14, %v3400_v14  ;;  %v1145_v17 = vmul.f32 %v1129_v6, %v1129_v6 }
 0x548   :  { %v3431_v10 = vadd.f32 %v1087_v32, %v2999_v25  ;;  %1210 = vadd.xlane.f32.xlu0 %v3393_v28  ;;  %v1073_v26 = vmul.f32 %v3384_v60, %v2118_v42  ;;  %2330 = vmatpush3.bf16.xpose.msra.mxu0 %v2329_v21  ;;  %v1049_v3 = vpop.f32.mrb[17].mxu0  ;;  %v1146_v32 = vmul.f32 %v1130_v43, %v1130_v43  ;;  %v2557_v42 = vld [vmem:[%s3779_s0 + $0x50] sm:$0xff] }
 0x549   :  { %v3440_v45 = vadd.f32 %v1086_v57, %v3003_v63  ;;  %2359 = vmatprep.subr.bf16.mxu1 %v2358_v1  ;;  %v1072_v25 = vmul.f32 %v3404_v39, %v1049_v3  ;;  %v1132_v21 = vsub.f32 %v3400_v14, %v2557_v42  ;;  %2331 = vmatprep.subr.bf16.mxu0 %v3831_v24 }
 0x54a   :  { %1216 = vadd.xlane.f32.xlu1 %v3418_v34  ;;  %1119 = vst [vmem:[%s3783_s4 + $0x68] sm:$0xff] %v3431_v10  ;;  %v1089_v6 = vmul.f32 0.33333334, %v1073_v26  ;;  %v1191_v63 = vmul.f32 %v3431_v10, %v3431_v10  ;;  %v1147_v43 = vmul.f32 %v1131_v41, %v1131_v41  ;;  %v1160_v42 = vadd.f32 %v1159_v40, %v1145_v17  ;;  %v2559_v17 = vld [vmem:[%s3779_s0 + $0x60] sm:$0xff] }
 0x54b   :  { %1118 = vst [vmem:[%s3783_s4 + $0x60] sm:$0xff] %v3440_v45  ;;  %v1088_v3 = vmul.f32 0.33333334, %v1072_v25  ;;  %v1190_v26 = vmul.f32 %v3440_v45, %v3440_v45  ;;  %v2332_v60 = vpack.c.bf16 %v3352_v48, %v3373_v47  ;;  %v2362_v25 = vpack.c.bf16 %v3357_v16, %v3361_v37 }
 0x54c   :  { %v3460_v57 = vadd.f32 %v1089_v6, %v3010_v4  ;;  %1214 = vadd.xlane.f32.xlu0 %v3437_v15  ;;  %v2558_v4 = vld [vmem:[%s3779_s0 + $0x58] sm:$0xff]  ;;  %v1134_v48 = vsub.f32 %v3440_v45, %v2559_v17  ;;  %v1148_v47 = vmul.f32 %v1132_v21, %v1132_v21  ;;  %v1161_v40 = vadd.f32 %v1160_v42, %v1146_v32  ;;  %v2560_v21 = vld [vmem:[%s3779_s0 + $0x68] sm:$0xff] }
 0x54d   :  { %v3468_v39 = vadd.f32 %v1088_v3, %v3014_v8  ;;  %v1133_v41 = vsub.f32 %v3387_v7, %v2558_v4  ;;  %v1135_v32 = vsub.f32 %v3431_v10, %v2560_v21  ;;  %v2561_v3 = vld [vmem:[%s3779_s0 + $0x70] sm:$0xff] }
 0x54e   :  { %1220 = vadd.xlane.f32.xlu1 %v1191_v63  ;;  %1121 = vst [vmem:[%s3783_s4 + $0x78] sm:$0xff] %v3460_v57  ;;  %2361 = vmatpush3.bf16.xpose.msra.mxu1 %v2358_v1  ;;  %v1193_v8 = vmul.f32 %v3460_v57, %v3460_v57  ;;  %v1162_v6 = vadd.f32 %v1161_v40, %v1147_v43 }
 0x54f   :  { %1120 = vst [vmem:[%s3783_s4 + $0x70] sm:$0xff] %v3468_v39  ;;  %2363 = vmatprep.subr.bf16.mxu1 %v2362_v25  ;;  %v1192_v1 = vmul.f32 %v3468_v39, %v3468_v39  ;;  %v1136_v42 = vsub.f32 %v3468_v39, %v2561_v3  ;;  %v1150_v4 = vmul.f32 %v1134_v48, %v1134_v48 }
 0x550   :  { %1218 = vadd.xlane.f32.xlu0 %v1190_v26  ;;  %2333 = vmatpush3.bf16.xpose.msra.mxu0 %v2332_v60  ;;  %v1149_v60 = vmul.f32 %v1133_v41, %v1133_v41  ;;  %v1163_v17 = vadd.f32 %v1162_v6, %v1148_v47  ;;  %v2366_v40 = vpack.c.bf16 %v3387_v7, %v3400_v14 }
 0x551   :  { %2334 = vmatprep.subr.bf16.mxu0 %v3831_v24  ;;  %v1151_v55 = vmul.f32 %v1135_v32, %v1135_v32  ;;  %v1152_v21 = vmul.f32 %v1136_v42, %v1136_v42  ;;  %v2370_v48 = vpack.c.bf16 %v3431_v10, %v3440_v45  ;;  %v2338_v47 = vpack.c.bf16 %v3418_v34, %v3437_v15 }
 0x552   :  { %1224 = vadd.xlane.f32.xlu1 %v1193_v8  ;;  %v1164_v43 = vadd.f32 %v1163_v17, %v1149_v60  ;;  %v2374_v22 = vpack.c.bf16 %v3460_v57, %v3468_v39 }
 0x554   :  { %1222 = vadd.xlane.f32.xlu0 %v1192_v1  ;;  %v1165_v12 = vadd.f32 %v1164_v43, %v1150_v4 }
 0x556   :  { %2365 = vmatpush3.bf16.xpose.msra.mxu1 %v2362_v25  ;;  %v1166_v58 = vadd.f32 %v1165_v12, %v1151_v55  ;;  %v2578_v55 = vmov 1.0  }
 0x557   :  { %2367 = vmatprep.subr.bf16.mxu1 %v2366_v40 }
 0x558   :  { %2336 = vmatpush3.bf16.xpose.msra.mxu0 %v2335_v53  ;;  %v3506_v41 = vadd.f32 %v1166_v58, %v1152_v21  ;;  %v2341_v53 = vpack.c.bf16 %v1191_v63, %v1190_v26  ;;  %v2344_v58 = vpack.c.bf16 %v1193_v8, %v1192_v1 }
 0x559   :  { %2337 = vmatprep.subr.bf16.mxu0 %v3831_v24 }
 0x55e   :  { %2369 = vmatpush3.bf16.xpose.msra.mxu1 %v2366_v40 }
 0x55f   :  { %2371 = vmatprep.subr.bf16.mxu1 %v2370_v48 }
 0x560   :  { %2339 = vmatpush3.bf16.xpose.msra.mxu0 %v2338_v47 }
 0x561   :  { %2340 = vmatprep.subr.bf16.mxu0 %v3831_v24 }
 0x566   :  { %2373 = vmatpush3.bf16.xpose.msra.mxu1 %v2370_v48 }
 0x567   :  { %2375 = vmatprep.subr.bf16.mxu1 %v2374_v22 }
 0x568   :  { %2342 = vmatpush3.bf16.xpose.msra.mxu0 %v2341_v53 }
 0x569   :  { %2343 = vmatprep.subr.bf16.mxu0 %v3831_v24 }
 0x56e   :  { %2377 = vmatpush3.bf16.xpose.msra.mxu1 %v2374_v22 }
 0x570   :  { %2345 = vmatpush3.bf16.xpose.msra.mxu0 %v2344_v58 }
 0x575   :  { %2187 = vmatmul.mubr.f32.vlgmr.msra.gmra.mrb[18].mxu1 %v3221_v51 }
 0x576   :  { %2189 = vmatprep.mubr.f32.mxu1 %v3252_v59 }
 0x577   :  { %2152 = vmatmul.mubr.f32.vlgmr.msra.gmra.mrb[18].mxu0 %v2578_v55 }
 0x579   :  { %2190 = vmatmul.mubr.f32.gmra.mrb[20].mxu1 %v3248_v46 }
 0x57a   :  { %2192 = vmatprep.mubr.f32.mxu1 %v3287_v62 }
 0x57d   :  { %2193 = vmatmul.mubr.f32.gmra.mrb[22].mxu1 %v3282_v2 }
 0x57e   :  { %2195 = vmatprep.mubr.f32.mxu1 %v3327_v20 }
 0x581   :  { %2196 = vmatmul.mubr.f32.gmra.mrb[24].mxu1 %v3318_v56 }
 0x582   :  { %2198 = vmatprep.mubr.f32.mxu1 %v3361_v37 }
 0x585   :  { %2199 = vmatmul.mubr.f32.gmra.mrb[26].mxu1 %v3357_v16 }
 0x586   :  { %2201 = vmatprep.mubr.f32.mxu1 %v3400_v14 }
 0x589   :  { %2202 = vmatmul.mubr.f32.gmra.mrb[28].mxu1 %v3387_v7 }
 0x58a   :  { %2204 = vmatprep.mubr.f32.mxu1 %v3440_v45 }
 0x58d   :  { %2205 = vmatmul.mubr.f32.gmra.mrb[30].mxu1 %v3431_v10 }
 0x58e   :  { %2207 = vmatprep.mubr.f32.mxu1 %v3468_v39 }
 0x591   :  { %2208 = vmatmul.mubr.f32.gmra.mrb[32].mxu1 %v3460_v57 }
 0x5c1   :  { %v1197_v51 = vpop.xlane.xlu1 %1196 }
 0x5c2   :  { %v1195_v46 = vpop.xlane.xlu0 %1194 }
 0x5c5   :  { %v1201_v59 = vpop.xlane.xlu1 %1200 }
 0x5c8   :  { %v1199_v12 = vpop.xlane.xlu0 %1198 }
 0x5c9   :  { %v1205_v2 = vpop.xlane.xlu1 %1204 }
 0x5cc   :  { %v1203_v62 = vpop.xlane.xlu0 %1202 }
 0x5cf   :  { %v1209_v56 = vpop.xlane.xlu1 %1208 }
 0x5d1   :  { %v1207_v20 = vpop.xlane.xlu0 %1206 }
 0x5d3   :  { %v1213_v16 = vpop.xlane.xlu1 %1212 }
 0x5d5   :  { %v1211_v14 = vpop.xlane.xlu0 %1210 }
 0x5d7   :  { %v1217_v10 = vpop.xlane.xlu1 %1216 }
 0x5d9   :  { %v1215_v8 = vpop.xlane.xlu0 %1214 }
 0x5db   :  { %v1221_v58 = vpop.xlane.xlu1 %1220 }
 0x648   :  { %v2188_v37 = vpop.f32.mrb[18].mxu1 }
 0x649   :  { %v1362_v24 = vpop.f32.mrb[19].mxu1  ;;  %v1462_v42 = vmul.f32 2.0, %v2188_v37 }
 0x64a   :  { %v1292_v7 = vpop.f32.mrb[18].mxu0  ;;  %v1461_v45 = vmul.f32 2.0, %v1362_v24 }
 0x64b   :  { %v3532_v28 = vrot.slane %v1292_v7, %v2760_v52  ;;  %v2153_v34 = vpop.f32.mrb[19].mxu0 }
 0x64c   :  { %v2191_v39 = vpop.f32.mrb[20].mxu1 }
 0x64d   :  { %v1445_v15 = vadd.f32 %v3532_v28, %v1195_v46  ;;  %v1448_v63 = vadd.f32 %v3532_v28, %v1201_v59  ;;  %v1464_v26 = vmul.f32 2.0, %v2191_v39  ;;  %v1372_v25 = vpop.f32.mrb[21].mxu1  ;;  %v1447_v1 = vadd.f32 %v3532_v28, %v1199_v12  ;;  %v1219_v12 = vpop.xlane.xlu0 %1218 }
 0x64e   :  { %v1463_v6 = vmul.f32 2.0, %v1372_v25  ;;  %v1450_v43 = vadd.f32 %v3532_v28, %v1205_v2  ;;  %v1449_v47 = vadd.f32 %v3532_v28, %v1203_v62  ;;  %v1446_v53 = vadd.f32 %v3532_v28, %v1197_v51 }
 0x64f   :  { %v1477_v32 = vsub.f32 %v1445_v15, %v1461_v45  ;;  %v1480_v3 = vsub.f32 %v1448_v63, %v1464_v26  ;;  %v1452_v46 = vadd.f32 %v3532_v28, %v1209_v56  ;;  %v1451_v59 = vadd.f32 %v3532_v28, %v1207_v20 }
 0x650   :  { %v1479_v60 = vsub.f32 %v1447_v1, %v1463_v6  ;;  %v2194_v52 = vpop.f32.mrb[22].mxu1  ;;  %v1454_v24 = vadd.f32 %v3532_v28, %v1213_v16  ;;  %v1478_v7 = vsub.f32 %v1446_v53, %v1462_v42  ;;  %v1453_v39 = vadd.f32 %v3532_v28, %v1211_v14 }
 0x651   :  { %v3537_v4 = vmax.f32 %v1477_v32, 0.0  ;;  %v3539_v17 = vmax.f32 %v1480_v3, 0.0  ;;  %v1466_v40 = vmul.f32 2.0, %v2194_v52  ;;  %v1382_v21 = vpop.f32.mrb[23].mxu1  ;;  %v1456_v20 = vadd.f32 %v3532_v28, %v1217_v10  ;;  %v1225_v10 = vpop.xlane.xlu1 %1224 }
 0x652   :  { %v3542_v48 = vmax.f32 %v1479_v60, 0.0  ;;  %v1465_v22 = vmul.f32 2.0, %v1382_v21  ;;  %v3558_v45 = vmax.f32 %v1478_v7, 0.0  ;;  %v1455_v16 = vadd.f32 %v3532_v28, %v1215_v8  ;;  %v1223_v8 = vpop.xlane.xlu0 %1222 }
 0x653   :  { %2515 = vrsqrt.f32 %v3537_v4  ;;  %v1482_v55 = vsub.f32 %v1450_v43, %v1466_v40  ;;  %v3563_v26 = vadd.f32 %v3532_v28, %v1221_v58  ;;  %v3567_v14 = vadd.f32 %v3532_v28, %v1219_v12 }
 0x654   :  { %2517 = vrsqrt.f32 %v3539_v17  ;;  %v1481_v2 = vsub.f32 %v1449_v47, %v1465_v22  ;;  %v2197_v37 = vpop.f32.mrb[24].mxu1  ;;  %vm1511_vm1 = vcmp.eq.f32.partialorder %v3537_v4, inf  ;;  %vm1513_vm2 = vcmp.eq.f32.partialorder %v3537_v4, 0.0 }
 0x655   :  { %2519 = vrsqrt.f32 %v3542_v48  ;;  %v3552_v62 = vmax.f32 %v1482_v55, 0.0  ;;  %v1468_v51 = vmul.f32 2.0, %v2197_v37  ;;  %v1392_v34 = vpop.f32.mrb[25].mxu1  ;;  %v1514_v52 = vand.u32 2147483648, %v3537_v4 }
 0x656   :  { %v3555_v15 = vmax.f32 %v1481_v2, 0.0  ;;  %v1467_v56 = vmul.f32 2.0, %v1392_v34  ;;  %v3578_v43 = vadd.f32 %v3532_v28, %v1225_v10  ;;  %v1521_v21 = vand.u32 2147483648, %v3558_v45 }
 0x657   :  { %2521 = vrsqrt.f32 %v3552_v62  ;;  %v1484_v63 = vsub.f32 %v1452_v46, %v1468_v51  ;;  %v3582_v47 = vadd.f32 %v3532_v28, %v1223_v8  ;;  %vm1532_vm3 = vcmp.eq.f32.partialorder %v3539_v17, inf }
 0x658   :  { %2523 = vrsqrt.f32 %v3555_v15  ;;  %v1483_v25 = vsub.f32 %v1451_v59, %v1467_v56  ;;  %v2200_v1 = vpop.f32.mrb[26].mxu1  ;;  %v1535_v58 = vand.u32 2147483648, %v3539_v17  ;;  %vm1525_vm4 = vcmp.eq.f32.partialorder %v3542_v48, inf }
 0x659   :  { %v3570_v6 = vmax.f32 %v1484_v63, 0.0  ;;  %v1470_v32 = vmul.f32 2.0, %v2200_v1  ;;  %v1402_v3 = vpop.f32.mrb[27].mxu1  ;;  %2525 = vrsqrt.f32 %v3558_v45  ;;  %vm1518_vm5 = vcmp.eq.f32.partialorder %v3558_v45, inf }
 0x65a   :  { %v3574_v42 = vmax.f32 %v1483_v25, 0.0  ;;  %v1469_v60 = vmul.f32 2.0, %v1402_v3  ;;  %vm1527_vm6 = vcmp.eq.f32.partialorder %v3542_v48, 0.0  ;;  %v1528_v28 = vand.u32 2147483648, %v3542_v48 }
 0x65b   :  { %v1486_v40 = vsub.f32 %v1454_v24, %v1470_v32  ;;  %2527 = vrsqrt.f32 %v3570_v6  ;;  %vm1520_vm7 = vcmp.eq.f32.partialorder %v3558_v45, 0.0  ;;  %vm1534_vm8 = vcmp.eq.f32.partialorder %v3539_v17, 0.0 }
 0x65c   :  { %v1485_v22 = vsub.f32 %v1453_v39, %v1469_v60  ;;  %v2203_v53 = vpop.f32.mrb[28].mxu1  ;;  %2529 = vrsqrt.f32 %v3574_v42  ;;  %vm1546_vm9 = vcmp.eq.f32.partialorder %v3552_v62, inf  ;;  %v1549_v56 = vand.u32 2147483648, %v3552_v62 }
 0x65d   :  { %v2516_v55 = vpop.eup %2515  ;;  %v3588_v46 = vmax.f32 %v1486_v40, 0.0  ;;  %v1472_v59 = vmul.f32 2.0, %v2203_v53  ;;  %v1412_v12 = vpop.f32.mrb[29].mxu1  ;;  %vm1539_vm10 = vcmp.eq.f32.partialorder %v3555_v15, inf  ;;  %vm1541_vm11 = vcmp.eq.f32.partialorder %v3555_v15, 0.0 }
 0x65e   :  { %v2518_v2 = vpop.eup %2517  ;;  %v3594_v37 = vmax.f32 %v1485_v22, 0.0  ;;  %v1471_v24 = vmul.f32 2.0, %v1412_v12  ;;  %v1510_v7 = vmul.f32 %v2516_v55, %v3537_v4  ;;  %vm1548_vm12 = vcmp.eq.f32.partialorder %v3552_v62, 0.0 }
 0x65f   :  { %v2520_v51 = vpop.eup %2519  ;;  %v1488_v34 = vsub.f32 %v1456_v20, %v1472_v59  ;;  %v1531_v39 = vmul.f32 %v2518_v2, %v3539_v17  ;;  %2531 = vrsqrt.f32 %v3588_v46  ;;  %vm1560_vm13 = vcmp.eq.f32.partialorder %v3570_v6, inf }
 0x660   :  { %v1487_v63 = vsub.f32 %v1455_v16, %v1471_v24  ;;  %v2206_v25 = vpop.f32.mrb[30].mxu1  ;;  %v1512_v1 = vsel %vm1511_vm1, %v3537_v4, %v1510_v7  ;;  %v1524_v10 = vmul.f32 %v2520_v51, %v3542_v48  ;;  %2533 = vrsqrt.f32 %v3594_v37 }
 0x661   :  { %v2522_v32 = vpop.eup %2521  ;;  %v3608_v20 = vmax.f32 %v1488_v34, 0.0  ;;  %v1474_v3 = vmul.f32 2.0, %v2206_v25  ;;  %v1422_v8 = vpop.f32.mrb[31].mxu1  ;;  %v1515_v60 = vsel %vm1513_vm2, %v1514_v52, %v1512_v1  ;;  %v1533_v4 = vsel %vm1532_vm3, %v3539_v17, %v1531_v39 }
 0x662   :  { %v2524_v16 = vpop.eup %2523  ;;  %v3614_v40 = vmax.f32 %v1487_v63, 0.0  ;;  %v1473_v22 = vmul.f32 2.0, %v1422_v8  ;;  %v1621_v53 = vmul.f32 %v3138_v13, %v1515_v60  ;;  %v1526_v52 = vsel %vm1525_vm4, %v3542_v48, %v1524_v10 }
 0x663   :  { %v2526_v55 = vpop.eup %2525  ;;  %2535 = vrsqrt.f32 %v3608_v20  ;;  %v1490_v59 = vsub.f32 %v3563_v26, %v1474_v3  ;;  %v1529_v24 = vsel %vm1527_vm6, %v1528_v28, %v1526_v52  ;;  %v1545_v39 = vmul.f32 %v2522_v32, %v3552_v62 }
 0x664   :  { %2537 = vrsqrt.f32 %v3614_v40  ;;  %v1489_v12 = vsub.f32 %v3567_v14, %v1473_v22  ;;  %v1517_v2 = vmul.f32 %v2526_v55, %v3558_v45  ;;  %1637 = vadd.xlane.f32.xlu0 %v1621_v53  ;;  %v2209_v13 = vpop.f32.mrb[32].mxu1  ;;  %v1623_v34 = vmul.f32 %v3148_v31, %v1529_v24 }
 0x665   :  { %v3630_v26 = vmax.f32 %v1490_v59, 0.0  ;;  %v1476_v7 = vmul.f32 2.0, %v2209_v13  ;;  %v1432_v51 = vpop.f32.mrb[33].mxu1  ;;  %v2528_v63 = vpop.eup %2527  ;;  %v1538_v10 = vmul.f32 %v2524_v16, %v3555_v15  ;;  %v1536_v31 = vsel %vm1534_vm8, %v1535_v58, %v1533_v4 }
 0x666   :  { %v3634_v25 = vmax.f32 %v1489_v12, 0.0  ;;  %v1519_v14 = vsel %vm1518_vm5, %v3558_v45, %v1517_v2  ;;  %v1475_v1 = vmul.f32 2.0, %v1432_v51  ;;  %v1542_v32 = vand.u32 2147483648, %v3555_v15  ;;  %v2530_v3 = vpop.eup %2529 }
 0x667   :  { %v1522_v48 = vsel %vm1520_vm7, %v1521_v21, %v1519_v14  ;;  %v1492_v28 = vsub.f32 %v3578_v43, %v1476_v7  ;;  %2539 = vrsqrt.f32 %v3630_v26  ;;  %v1547_v45 = vsel %vm1546_vm9, %v3552_v62, %v1545_v39 }
 0x668   :  { %v1622_v8 = vmul.f32 %v3136_v29, %v1522_v48  ;;  %v1491_v60 = vsub.f32 %v3582_v47, %v1475_v1  ;;  %1641 = vadd.xlane.f32.xlu0 %v1623_v34  ;;  %2541 = vrsqrt.f32 %v3634_v25  ;;  %v1540_v17 = vsel %vm1539_vm10, %v3555_v15, %v1538_v10 }
 0x669   :  { %v3655_v43 = vmax.f32 %v1492_v28, 0.0  ;;  %v1559_v21 = vmul.f32 %v2528_v63, %v3570_v6  ;;  %v2532_v58 = vpop.eup %2531  ;;  %v1543_v47 = vsel %vm1541_vm11, %v1542_v32, %v1540_v17  ;;  %v1550_v16 = vsel %vm1548_vm12, %v1549_v56, %v1547_v45 }
 0x66a   :  { %1639 = vadd.xlane.f32.xlu1 %v1622_v8  ;;  %v3661_v29 = vmax.f32 %v1491_v60, 0.0  ;;  %v1625_v22 = vmul.f32 %v3158_v18, %v1543_v47  ;;  %v2534_v53 = vpop.eup %2533  ;;  %v1624_v55 = vmul.f32 %v3146_v30, %v1536_v31  ;;  %v1552_v4 = vmul.f32 %v2530_v3, %v3574_v42 }
 0x66b   :  { %2543 = vrsqrt.f32 %v3655_v43  ;;  %v1561_v59 = vsel %vm1560_vm13, %v3570_v6, %v1559_v21  ;;  %v1563_v15 = vand.u32 2147483648, %v3570_v6  ;;  %vm1553_vm14 = vcmp.eq.f32.partialorder %v3574_v42, inf }
 0x66c   :  { %2545 = vrsqrt.f32 %v3661_v29  ;;  %1645 = vadd.xlane.f32.xlu0 %v1625_v22  ;;  %v1556_v56 = vand.u32 2147483648, %v3574_v42  ;;  %v1573_v18 = vmul.f32 %v2532_v58, %v3588_v46  ;;  %v1626_v12 = vmul.f32 %v3156_v33, %v1550_v16 }
 0x66d   :  { %v2536_v62 = vpop.eup %2535  ;;  %vm1562_vm15 = vcmp.eq.f32.partialorder %v3570_v6, 0.0  ;;  %v1554_v30 = vsel %vm1553_vm14, %v3574_v42, %v1552_v4  ;;  %vm1555_vm0 = vcmp.eq.f32.partialorder %v3574_v42, 0.0  ;;  %vm1574_vm1 = vcmp.eq.f32.partialorder %v3588_v46, inf }
 0x66e   :  { %v2538_v52 = vpop.eup %2537  ;;  %1643 = vadd.xlane.f32.xlu1 %v1624_v55  ;;  %v1564_v2 = vsel %vm1562_vm15, %v1563_v15, %v1561_v59  ;;  %v1557_v13 = vsel %vm1555_vm0, %v1556_v56, %v1554_v30  ;;  %v1566_v24 = vmul.f32 %v2534_v53, %v3594_v37  ;;  %v1575_v51 = vsel %vm1574_vm1, %v3588_v46, %v1573_v18 }
 0x66f   :  { %v1627_v7 = vmul.f32 %v3168_v36, %v1557_v13  ;;  %vm1567_vm2 = vcmp.eq.f32.partialorder %v3594_v37, inf  ;;  %v1570_v33 = vand.u32 2147483648, %v3594_v37  ;;  %v1577_v6 = vand.u32 2147483648, %v3588_v46 }
 0x670   :  { %v1568_v34 = vsel %vm1567_vm2, %v3594_v37, %v1566_v24  ;;  %vm1569_vm3 = vcmp.eq.f32.partialorder %v3594_v37, 0.0  ;;  %v1587_v42 = vmul.f32 %v2536_v62, %v3608_v20  ;;  %vm1576_vm4 = vcmp.eq.f32.partialorder %v3588_v46, 0.0  ;;  %v2562_v62 = vld [vmem:[%s3779_s0 + $0x78] sm:$0xff] }
 0x671   :  { %v2540_v39 = vpop.eup %2539  ;;  %1649 = vadd.xlane.f32.xlu0 %v1627_v7  ;;  %v1571_v36 = vsel %vm1569_vm3, %v1570_v33, %v1568_v34  ;;  %v1580_v63 = vmul.f32 %v2538_v52, %v3614_v40  ;;  %v1628_v1 = vmul.f32 %v3166_v11, %v1564_v2  ;;  %v1578_v10 = vsel %vm1576_vm4, %v1577_v6, %v1575_v51 }
 0x672   :  { %1647 = vadd.xlane.f32.xlu1 %v1626_v12  ;;  %v2542_v14 = vpop.eup %2541  ;;  %vm1581_vm5 = vcmp.eq.f32.partialorder %v3614_v40, inf  ;;  %v1629_v48 = vmul.f32 %v3178_v50, %v1571_v36  ;;  %vm1588_vm6 = vcmp.eq.f32.partialorder %v3608_v20, inf  ;;  %v1584_v28 = vand.u32 2147483648, %v3614_v40 }
 0x673   :  { %v1582_v37 = vsel %vm1581_vm5, %v3614_v40, %v1580_v63  ;;  %v1589_v46 = vsel %vm1588_vm6, %v3608_v20, %v1587_v42  ;;  %vm1583_vm7 = vcmp.eq.f32.partialorder %v3614_v40, 0.0  ;;  %v1601_v3 = vmul.f32 %v2540_v39, %v3630_v26  ;;  %v3834_v39 = vld [vmem:[#allocation5_spill] sm:$0xff]  ;;  %v3835_v63 = vld [vmem:[#allocation7_spill] sm:$0xff] }
 0x674   :  { %v1585_v11 = vsel %vm1583_vm7, %v1584_v28, %v1582_v37  ;;  %v1594_v8 = vmul.f32 %v2542_v14, %v3634_v25  ;;  %v1630_v50 = vmul.f32 %v3176_v49, %v1578_v10  ;;  %v1591_v60 = vand.u32 2147483648, %v3608_v20  ;;  %v3836_v28 = vld [vmem:[#allocation6_spill] sm:$0xff] }
 0x675   :  { %v2544_v31 = vpop.eup %2543  ;;  %1653 = vadd.xlane.f32.xlu0 %v1629_v48  ;;  %vm1595_vm8 = vcmp.eq.f32.partialorder %v3634_v25, inf  ;;  %v1598_v45 = vand.u32 2147483648, %v3634_v25  ;;  %vm1590_vm9 = vcmp.eq.f32.partialorder %v3608_v20, 0.0  ;;  %v1631_v40 = vmul.f32 %v3186_v19, %v1585_v11 }
 0x676   :  { %v2546_v32 = vpop.eup %2545  ;;  %1651 = vadd.xlane.f32.xlu1 %v1628_v1  ;;  %v1596_v17 = vsel %vm1595_vm8, %v3634_v25, %v1594_v8  ;;  %vm1597_vm10 = vcmp.eq.f32.partialorder %v3634_v25, 0.0  ;;  %v1592_v21 = vsel %vm1590_vm9, %v1591_v60, %v1589_v46  ;;  %vm1602_vm11 = vcmp.eq.f32.partialorder %v3630_v26, inf  ;;  %v3837_v46 = vld [vmem:[#allocation9_spill] sm:$0xff] }
 0x677   :  { %v1599_v58 = vsel %vm1597_vm10, %v1598_v45, %v1596_v17  ;;  %v1608_v49 = vmul.f32 %v2546_v32, %v3661_v29  ;;  %v1603_v47 = vsel %vm1602_vm11, %v3630_v26, %v1601_v3  ;;  %v1615_v16 = vmul.f32 %v2544_v31, %v3655_v43 }
 0x678   :  { %vm1609_vm12 = vcmp.eq.f32.partialorder %v3661_v29, inf  ;;  %v1605_v19 = vand.u32 2147483648, %v3630_v26  ;;  %v1612_v25 = vand.u32 2147483648, %v3661_v29  ;;  %v1632_v22 = vmul.f32 %v3184_v9, %v1592_v21  ;;  %v3839_v21 = vld [vmem:[#allocation11_spill] sm:$0xff] }
 0x679   :  { %1657 = vadd.xlane.f32.xlu0 %v1631_v40  ;;  %v1610_v20 = vsel %vm1609_vm12, %v3661_v29, %v1608_v49  ;;  %vm1604_vm13 = vcmp.eq.f32.partialorder %v3630_v26, 0.0  ;;  %v1633_v53 = vmul.f32 %v3194_v35, %v1599_v58  ;;  %vm1611_vm14 = vcmp.eq.f32.partialorder %v3661_v29, 0.0  ;;  %v3838_v40 = vld [vmem:[#allocation8_spill] sm:$0xff] }
 0x67a   :  { %1655 = vadd.xlane.f32.xlu1 %v1630_v50  ;;  %v1606_v55 = vsel %vm1604_vm13, %v1605_v19, %v1603_v47  ;;  %vm1616_vm15 = vcmp.eq.f32.partialorder %v3655_v43, inf  ;;  %v1613_v59 = vsel %vm1611_vm14, %v1612_v25, %v1610_v20  ;;  %v1137_v9 = vsub.f32 %v3460_v57, %v2562_v62 }
 0x67b   :  { %v1617_v4 = vsel %vm1616_vm15, %v3655_v43, %v1615_v16  ;;  %v1619_v26 = vand.u32 2147483648, %v3655_v43  ;;  %v1634_v35 = vmul.f32 %v3192_v44, %v1606_v55  ;;  %vm1618_vm0 = vcmp.eq.f32.partialorder %v3655_v43, 0.0  ;;  %v3841_v55 = vld [vmem:[#allocation13_spill] sm:$0xff] }
 0x67c   :  { %v1635_v29 = vmul.f32 %v3202_v5, %v1613_v59  ;;  %v1153_v56 = vmul.f32 %v1137_v9, %v1137_v9  ;;  %vm1685_vm1 = vcmask 7168  }
 0x67d   :  { %1661 = vadd.xlane.f32.xlu0 %v1633_v53  ;;  %v1620_v15 = vsel %vm1618_vm0, %v1619_v26, %v1617_v4 }
 0x67e   :  { %1659 = vadd.xlane.f32.xlu1 %v1632_v22  ;;  %v1636_v18 = vmul.f32 %v3200_v54, %v1620_v15  ;;  %v1168_v52 = vadd.f32 %v3506_v41, %v1153_v56  ;;  %v3840_v22 = vld [vmem:[#allocation10_spill] sm:$0xff]  ;;  %v3842_v15 = vld [vmem:[#allocation12_spill] sm:$0xff] }
 0x681   :  { %1665 = vadd.xlane.f32.xlu0 %v1635_v29 }
 0x682   :  { %1663 = vadd.xlane.f32.xlu1 %v1634_v35 }
 0x685   :  { %1169 = vadd.xlane.f32.xlu0 %v1168_v52 }
 0x686   :  { %1667 = vadd.xlane.f32.xlu1 %v1636_v18  ;;  %v3843_v18 = vld [vmem:[#allocation15_spill] sm:$0xff] }
 0x6f1   :  { %v1638_v12 = vpop.xlane.xlu0 %1637 }
 0x6f2   :  { %v1669_v57 = vmul.f32 %v3212_v38, %v1638_v12 }
 0x6f4   :  { %v1686_v2 = vsel %vm1685_vm1, %v1669_v57, 0.0 }
 0x6f5   :  { %v1642_v30 = vpop.xlane.xlu0 %1641 }
 0x6f6   :  { %v1671_v44 = vmul.f32 %v3218_v0, %v1642_v30 }
 0x6f7   :  { %v1640_v43 = vpop.xlane.xlu1 %1639 }
 0x6f8   :  { %v1670_v5 = vmul.f32 %v3210_v23, %v1640_v43  ;;  %v1689_v54 = vsel %vm1685_vm1, %v1671_v44, 0.0 }
 0x6f9   :  { %v1646_v24 = vpop.xlane.xlu0 %1645 }
 0x6fa   :  { %v1687_v13 = vsel %vm1685_vm1, %v1670_v5, 0.0  ;;  %v1673_v51 = vmul.f32 %v3245_v27, %v1646_v24 }
 0x6fb   :  { %v1688_v41 = vadd.f32 %v1687_v13, %v1686_v2  ;;  %v1644_v7 = vpop.xlane.xlu1 %1643  ;;  %v3844_v2 = vld [vmem:[#allocation14_spill] sm:$0xff] }
 0x6fc   :  { %v1672_v38 = vmul.f32 %v3216_v61, %v1644_v7  ;;  %v1693_v0 = vsel %vm1685_vm1, %v1673_v51, 0.0 }
 0x6fd   :  { %v1690_v33 = vadd.f32 %v1689_v54, %v1688_v41 }
 0x6fe   :  { %v1691_v6 = vsel %vm1685_vm1, %v1672_v38, 0.0  ;;  %v1650_v42 = vpop.xlane.xlu0 %1649 }
 0x6ff   :  { %v1648_v34 = vpop.xlane.xlu1 %1647  ;;  %v1692_v23 = vadd.f32 %v1691_v6, %v1690_v33  ;;  %v1675_v14 = vmul.f32 %v3835_v63, %v1650_v42 }
 0x700   :  { %v1674_v36 = vmul.f32 %v3834_v39, %v1648_v34 }
 0x701   :  { %v1694_v1 = vadd.f32 %v1693_v0, %v1692_v23  ;;  %v1697_v48 = vsel %vm1685_vm1, %v1675_v14, 0.0 }
 0x702   :  { %v1695_v10 = vsel %vm1685_vm1, %v1674_v36, 0.0  ;;  %v1654_v61 = vpop.xlane.xlu0 %1653 }
 0x703   :  { %v1652_v27 = vpop.xlane.xlu1 %1651  ;;  %v1696_v37 = vadd.f32 %v1695_v10, %v1694_v1  ;;  %v1677_v32 = vmul.f32 %v3837_v46, %v1654_v61 }
 0x704   :  { %v1676_v31 = vmul.f32 %v3836_v28, %v1652_v27 }
 0x705   :  { %v1698_v11 = vadd.f32 %v1697_v48, %v1696_v37  ;;  %v1701_v8 = vsel %vm1685_vm1, %v1677_v32, 0.0 }
 0x706   :  { %v1699_v3 = vsel %vm1685_vm1, %v1676_v31, 0.0  ;;  %v1658_v45 = vpop.xlane.xlu0 %1657 }
 0x707   :  { %v1656_v50 = vpop.xlane.xlu1 %1655  ;;  %v1700_v60 = vadd.f32 %v1699_v3, %v1698_v11  ;;  %v1679_v58 = vmul.f32 %v3839_v21, %v1658_v45 }
 0x708   :  { %v1678_v17 = vmul.f32 %v3838_v40, %v1656_v50 }
 0x709   :  { %v1702_v49 = vadd.f32 %v1701_v8, %v1700_v60  ;;  %v1705_v16 = vsel %vm1685_vm1, %v1679_v58, 0.0 }
 0x70a   :  { %v1703_v47 = vsel %vm1685_vm1, %v1678_v17, 0.0  ;;  %v1662_v25 = vpop.xlane.xlu0 %1661 }
 0x70b   :  { %v1660_v19 = vpop.xlane.xlu1 %1659  ;;  %v1704_v20 = vadd.f32 %v1703_v47, %v1702_v49  ;;  %v1681_v59 = vmul.f32 %v3841_v55, %v1662_v25 }
 0x70c   :  { %v1680_v53 = vmul.f32 %v3840_v22, %v1660_v19 }
 0x70d   :  { %v1706_v4 = vadd.f32 %v1705_v16, %v1704_v20  ;;  %v1709_v9 = vsel %vm1685_vm1, %v1681_v59, 0.0 }
 0x70e   :  { %v1707_v62 = vsel %vm1685_vm1, %v1680_v53, 0.0  ;;  %v1666_v29 = vpop.xlane.xlu0 %1665 }
 0x70f   :  { %v1664_v26 = vpop.xlane.xlu1 %1663  ;;  %v1708_v35 = vadd.f32 %v1707_v62, %v1706_v4  ;;  %v1683_v52 = vmul.f32 %v3843_v18, %v1666_v29 }
 0x710   :  { %v1682_v56 = vmul.f32 %v3842_v15, %v1664_v26 }
 0x711   :  { %v1710_v12 = vadd.f32 %v1709_v9, %v1708_v35  ;;  %v1713_v30 = vsel %vm1685_vm1, %v1683_v52, 0.0 }
 0x712   :  { %v1711_v57 = vsel %vm1685_vm1, %v1682_v56, 0.0  ;;  %v1170_v5 = vpop.xlane.xlu0 %1169 }
 0x713   :  { %v1668_v44 = vpop.xlane.xlu1 %1667  ;;  %v1712_v43 = vadd.f32 %v1711_v57, %v1710_v12  ;;  %v1171_v54 = vrot.slane %v1170_v5, 4 }
 0x714   :  { %v1684_v13 = vmul.f32 %v3844_v2, %v1668_v44 }
 0x715   :  { %v1714_v24 = vadd.f32 %v1713_v30, %v1712_v43  ;;  %v1172_v7 = vadd.f32 %v1171_v54, %v1170_v5 }
 0x716   :  { %v1715_v41 = vsel %vm1685_vm1, %v1684_v13, 0.0 }
 0x717   :  { %v1716_v51 = vadd.f32 %v1715_v41, %v1714_v24  ;;  %v1173_v38 = vrot.slane %v1172_v7, 2 }
 0x719   :  { %1717 = vadd.xlane.f32.xlu1 %v1716_v51  ;;  %v1174_v33 = vadd.f32 %v1173_v38, %v1172_v7 }
 0x71b   :  { %v1175_v6 = vrot.slane %v1174_v33, 1 }
 0x71d   :  { %v1176_v0 = vadd.f32 %v1175_v6, %v1174_v33 }
 0x71f   :  { %2378 = vpush %v1176_v0 }
 0x750   :  { %s2379_s0 = spop %2378 }
 0x7a6   :  { %v1718_v34 = vpop.xlane.xlu1 %1717 }
 0x7a7   :  { %v1719_v23 = vrot.slane %v1718_v34, 4 }
 0x7a9   :  { %v1720_v42 = vadd.f32 %v1719_v23, %v1718_v34 }
 0x7ab   :  { %v1721_v39 = vrot.slane %v1720_v42, 2 }
 0x7ad   :  { %v1722_v36 = vadd.f32 %v1721_v39, %v1720_v42 }
 0x7af   :  { %v1723_v63 = vrot.slane %v1722_v36, 1 }
 0x7b1   :  { %v1724_v14 = vadd.f32 %v1723_v63, %v1722_v36 }
 0x7b3   :  { %2380 = vpush %v1724_v14 }
 0x7e4   :  { %s2381_s23 = spop %2380 }
 0x7e5   :  { %s1726_s24 = smul.f32 0.5, %s2381_s23 }
 0x7e7   :  { %s1727_s25 = sadd.f32 %s2379_s0, %s1726_s24 }
 0x7e9   :  { %s1730_s26 = smul.f32 0.0625, %s1727_s25 }
 0x7eb   :  { %1732 = sst [smem:[#allocation2]] %s1730_s26 }
 0x7ec   :  { %2572 = shalt.err (!%p2569_p2)
}
 0x7ed   :  { %s2579_s8 = smov [#allocation2]  }
 0x7ee   :  { %1742 = dma.smem_to_hbm %s2579_s8, 16, %s3784_s5, [#allocation3]  }
 0x7ef   :  { %2573 = dma.done.wait [#allocation3], 16  }
 0x7f0   :  { %2574 = vsyncadd [#allocation3], 4294967280 }
 0x7f1   :  { %1748 = sfence }
 0x7f2   :  { %1749 = vsyncpa [#allocation3], 1 }

</bundles_post_ra>
